<compile_context>
chip_gen: v7x
topology: tpu7x:2x2x1
jax: 0.10.0
libtpu: 0.0.40
codegen_flags: <defaults>
</compile_context>

<pallas_src>
import functools

import numpy as np
import jax
import jax.numpy as jnp
from jax.experimental import pallas as pl
from jax.experimental.pallas import tpu as pltpu

BN_EPS = 1e-5
LANE = 128


# ----------------------------------------------------------------------------------
# Host-side (numpy) sampling & grouping glue — faithful port of the torch helpers.
# ----------------------------------------------------------------------------------
def index_points_np(points, idx):
    B = points.shape[0]
    bidx = np.arange(B).reshape((B,) + (1,) * (idx.ndim - 1))
    return points[bidx, idx]


def get_neighbor_index_np(vertices, neighbor_num, is_backdis=False):
    inner = vertices @ vertices.transpose(0, 2, 1)
    quadratic = np.sum(vertices ** 2, axis=2)
    distance = inner * -2.0 + quadratic[:, None, :] + quadratic[:, :, None]
    order = np.argsort(distance, axis=-1, kind="stable")[:, :, : neighbor_num + 1]
    neighbor_index = order[:, :, 1:]
    if is_backdis:
        return neighbor_index, distance
    return neighbor_index


def farthest_point_sample_np(xyz, n_samples):
    B, N, _ = xyz.shape
    centroids = np.zeros((B, n_samples), dtype=np.int64)
    distance = np.full((B, N), 1e10, dtype=np.float64)
    # torch.randint replaced by a fixed seed for determinism
    farthest = np.random.RandomState(0).randint(0, N, size=(B,)).astype(np.int64)
    batch_indices = np.arange(B)
    for i in range(n_samples):
        centroids[:, i] = farthest
        centroid = xyz[batch_indices, farthest, :].reshape(B, 1, 3)
        dist = np.sum((xyz - centroid) ** 2, axis=-1)
        mask = dist < distance
        distance[mask] = dist[mask]
        farthest = np.argmax(distance, axis=-1)
    return centroids


def surface_knn_np(points_all, k_near=100, n_stepk=10):
    ind_neighbor_all, all_dist = get_neighbor_index_np(points_all, n_stepk, True)
    neighbor_index_max = np.argmax(all_dist, axis=-1)[:, :, None]
    new_neighinds = ind_neighbor_all.copy()
    num_ita = 0
    while True:
        n_current = new_neighinds.shape[-1]
        indexed_all = [index_points_np(ind_neighbor_all, new_neighinds[:, :, j])
                       for j in range(n_current)]
        new_neighinds = np.concatenate(indexed_all, axis=-1)
        new_neighinds = np.sort(new_neighinds, axis=-1)
        duplicates = np.zeros_like(new_neighinds, dtype=bool)
        duplicates[:, :, 1:] = new_neighinds[:, :, 1:] == new_neighinds[:, :, :-1]
        nm2 = np.repeat(neighbor_index_max, new_neighinds.shape[-1], axis=-1)
        new_neighinds[duplicates] = nm2[duplicates]
        dist_neighinds = np.take_along_axis(all_dist, new_neighinds, axis=-1)
        sort_dist = np.sort(dist_neighinds, axis=-1)
        sort_dist_maxind = np.argmax(sort_dist, axis=-1)
        valid_nnear = int(sort_dist_maxind.min()) + 1
        is_end_loop = False
        if valid_nnear >= k_near + 1:
            valid_nnear = k_near + 1
            is_end_loop = True
        sub_idx = np.argsort(dist_neighinds, axis=-1, kind="stable")[:, :, :valid_nnear]
        new_neighinds = np.take_along_axis(new_neighinds, sub_idx, axis=-1)
        new_neighinds = new_neighinds[:, :, 1:]
        if is_end_loop:
            break
        num_ita += 1
        if num_ita > 20:
            print("max surface knn iteration count, return knn")
            return ind_neighbor_all
    return new_neighinds


def sa_sample_and_group_np(n_center, n_near, xyz, fea):
    idx_surfknn_all = surface_knn_np(xyz, n_near, 10)
    if n_center is None:
        new_xyz = xyz
        idx = idx_surfknn_all
        grouped_xyz = index_points_np(xyz, idx_surfknn_all)
    else:
        fps_idx = farthest_point_sample_np(xyz, n_center)
        new_xyz = index_points_np(xyz, fps_idx)
        idx = index_points_np(idx_surfknn_all, fps_idx)
        grouped_xyz = index_points_np(xyz, idx)
    grouped_xyz_norm = grouped_xyz - new_xyz[:, :, None, :]
    if fea is not None:
        grouped_fea = index_points_np(fea, idx)
        new_fea = np.concatenate([grouped_xyz_norm, grouped_fea], axis=-1)
    else:
        new_fea = grouped_xyz_norm
    return new_xyz.astype(np.float32), new_fea.astype(np.float32)


# ----------------------------------------------------------------------------------
# Tiling helpers (VMEM-budget aware)
# ----------------------------------------------------------------------------------
def _round_up(x, m):
    return ((x + m - 1) // m) * m


def _vmem_capacity_bytes():
    try:
        return int(pltpu.get_tpu_info().vmem_capacity_bytes)
    except Exception:
        return 64 * 1024 * 1024  # conservative (v7x per-TensorCore VMEM)


def _choose_tile_m(m_real, cin, cpad_max, K, vmem_limit, max_tm=None):
    """Single row-tile for all passes: a multiple of 8*K (neighbor groups never
    straddle a tile; group outputs stay sublane-aligned), as large as the VMEM budget
    allows, but small enough that the grid has >= 2 blocks when possible (keeps both
    v7x TensorCores busy; costs nothing on single-TC v5e/v6e)."""
    gr = 8 * K
    budget = int(vmem_limit * 0.7)
    tm = gr
    for t in (16384, 8192, 4096, 2048, 1024, 512, 256, 128, 64, 32, 16, 8):
        tt = max(gr, (t // gr) * gr)
        need = (2 * tt * cin * 4                       # x block, double-buffered (f32)
                + 4 * tt * cpad_max * 4                # in-VMEM activation temporaries
                + 2 * 2 * (tt // K) * cpad_max * 4     # group max/min outputs, dbl-buf
                + (1 << 20))                           # weights / stats / headroom
        if need <= budget:
            tm = tt
            break
    if max_tm is not None:
        tm = min(tm, max(gr, (max_tm // gr) * gr))
    if m_real > gr:                                    # >= 2 grid blocks when possible
        tm = min(tm, _round_up((m_real + 1) // 2, gr))
    tm = min(tm, _round_up(m_real, gr))                # don't over-pad tiny problems
    return max(gr, tm)


# ----------------------------------------------------------------------------------
# Pallas kernels (the hot path)
# ----------------------------------------------------------------------------------
def _make_pass_kernel(layer_idx, tm, K, m_real, m_pad, is_last):
    """Pass `layer_idx`: recompute layers 0..layer_idx-1 in VMEM from the X tile
    (their folded BN-affine + ReLU fused in), run layer `layer_idx`'s matmul, and emit
    per-block Welford partials (sum, M2-about-block-mean) of y; on the last pass also
    emit the per-(b,s)-group max and min of y over the K neighbor rows."""
    n_prev = layer_idx

    def kernel(*refs):
        x_ref = refs[0]
        pos = 1
        s_refs = refs[pos:pos + n_prev]; pos += n_prev
        t_refs = refs[pos:pos + n_prev]; pos += n_prev
        w_refs = refs[pos:pos + n_prev + 1]; pos += n_prev + 1
        sum_ref, m2_ref = refs[pos], refs[pos + 1]; pos += 2
        if is_last:
            gmax_ref, gmin_ref = refs[pos], refs[pos + 1]

        a = x_ref[...].astype(jnp.float32)
        for j in range(n_prev):
            yj = jnp.dot(a.astype(jnp.bfloat16), w_refs[j][...],
                         preferred_element_type=jnp.float32)
            # previous layer's BN affine + ReLU (f32; v5e-safe), recomputed/fused here
            a = jnp.maximum(yj * s_refs[j][...] + t_refs[j][...], 0.0)
        y = jnp.dot(a.astype(jnp.bfloat16), w_refs[n_prev][...],
                    preferred_element_type=jnp.float32)             # (tm, cpad)
        cpad = y.shape[1]

        # --- per-block Welford partials (padded rows masked out of the statistics) ---
        if m_pad != m_real:
            row = (pl.program_id(0) * tm
                   + jax.lax.broadcasted_iota(jnp.int32, (tm, 1), 0))
            valid = row < m_real
            yv = jnp.where(valid, y, 0.0)
            n_b = jnp.minimum(tm, m_real - pl.program_id(0) * tm).astype(jnp.float32)
        else:
            valid = None
            yv = y
            n_b = float(tm)
        s = jnp.sum(yv, axis=0, keepdims=True)                      # (1, cpad)
        d = y - s / n_b                                              # dev. from block mean
        if valid is not None:
            d = jnp.where(valid, d, 0.0)
        m2 = jnp.sum(d * d, axis=0, keepdims=True)                   # (1, cpad)
        sum_ref[...] = s[None]
        m2_ref[...] = m2[None]

        if is_last:
            # tm % (8*K) == 0, so groups of K consecutive rows never straddle a tile
            # and padded rows only form whole padded groups (sliced off in the wrapper).
            yg = y.reshape(tm // K, K, cpad)
            gmax_ref[...] = jnp.max(yg, axis=1)
            gmin_ref[...] = jnp.min(yg, axis=1)

    return kernel


def _run_pass(x_pad, ws, scales, shifts, layer_idx, *, K, tm, m_real, m_pad,
              is_last, vmem_limit):
    num_blocks = m_pad // tm
    cin = x_pad.shape[1]
    cpad = ws[layer_idx].shape[1]

    in_specs = [pl.BlockSpec((tm, cin), lambda i: (i, 0))]
    args = [x_pad]
    for j in range(layer_idx):
        cj = scales[j].shape[-1]
        in_specs.append(pl.BlockSpec((1, cj), lambda i: (0, 0)))
        args.append(scales[j].reshape(1, cj))
    for j in range(layer_idx):
        cj = shifts[j].shape[-1]
        in_specs.append(pl.BlockSpec((1, cj), lambda i: (0, 0)))
        args.append(shifts[j].reshape(1, cj))
    for j in range(layer_idx + 1):
        in_specs.append(pl.BlockSpec(ws[j].shape, lambda i: (0, 0)))
        args.append(ws[j])

    out_shape = [jax.ShapeDtypeStruct((num_blocks, 1, cpad), jnp.float32),
                 jax.ShapeDtypeStruct((num_blocks, 1, cpad), jnp.float32)]
    out_specs = [pl.BlockSpec((1, 1, cpad), lambda i: (i, 0, 0)),
                 pl.BlockSpec((1, 1, cpad), lambda i: (i, 0, 0))]
    if is_last:
        out_shape += [jax.ShapeDtypeStruct((m_pad // K, cpad), jnp.float32)] * 2
        out_specs += [pl.BlockSpec((tm // K, cpad), lambda i: (i, 0))] * 2

    return pl.pallas_call(
        _make_pass_kernel(layer_idx, tm, K, m_real, m_pad, is_last),
        out_shape=tuple(out_shape),
        grid=(num_blocks,),
        in_specs=in_specs,
        out_specs=tuple(out_specs),
        compiler_params=pltpu.CompilerParams(
            dimension_semantics=("parallel",),
            vmem_limit_bytes=vmem_limit),
    )(*args)


def _combine_block_stats(psum, pm2, tm, m_real):
    """Chan's parallel combine of per-block (sum, M2-about-block-mean) partials."""
    num_blocks = psum.shape[0]
    s = psum[:, 0, :]                                                # (nb, C)
    m2 = pm2[:, 0, :]
    starts = jnp.arange(num_blocks, dtype=jnp.int32) * tm
    n_b = jnp.clip(m_real - starts, 0, tm).astype(jnp.float32)[:, None]
    mean = jnp.sum(s, axis=0) / m_real                               # (C,)
    mean_b = s / n_b
    m2_tot = jnp.sum(m2, axis=0) + jnp.sum(n_b * (mean_b - mean) ** 2, axis=0)
    var = jnp.maximum(m2_tot / m_real, 0.0)                          # biased (BN training)
    return mean, var


# ----------------------------------------------------------------------------------
# SA_Attention MLP + max  (fused Pallas pipeline, under jit)
# ----------------------------------------------------------------------------------
def init_params(key, in_channel, mlp):
    ws, bs, gammas, betas = [], [], [], []
    last = in_channel
    for out_c in mlp:
        key, kw, kb = jax.random.split(key, 3)
        # conv weight (out_c, last, 1, 1) stored transposed as (last, out_c)
        ws.append(jax.random.normal(kw, (last, out_c), jnp.float32) / np.sqrt(last))
        bs.append(jax.random.normal(kb, (out_c,), jnp.float32) * 0.01)
        gammas.append(jnp.ones((out_c,), jnp.float32))
        betas.append(jnp.zeros((out_c,), jnp.float32))
        last = out_c
    return {"w": ws, "b": bs, "gamma": gammas, "beta": betas}


@functools.partial(jax.jit, static_argnames=("max_tm",))
def mlp_max_pallas(new_fea, params, max_tm=None):
    """new_fea: (B, S, K, Cin) float32 -> (B, C_last, S) float32."""
    B, S, K, Cin = new_fea.shape
    m_real = B * S * K
    L = len(params["w"])

    # Scoped-VMEM limit clamped to 48 MiB so a per-chip capacity query is still safe
    # on v7x (64 MiB per TensorCore); plenty for this kernel on all generations.
    cap = _vmem_capacity_bytes()
    vmem_limit = min(int(cap * 0.75), 48 * 1024 * 1024)

    # --- pad output channels to lane width (128); weights to bf16 (MXU-native).
    #     Intermediates never touch HBM (recompute), so this padding costs no traffic.
    #     The conv bias is dropped: it is exactly cancelled by the BN mean subtraction.
    ws, gs, betas, couts = [], [], [], []
    last_pad = Cin   # layer-0 contraction depth left unpadded (tiny; pass is HBM-bound)
    for i in range(L):
        w = params["w"][i]
        cin_i, cout_i = w.shape
        cout_pad = _round_up(cout_i, LANE)
        wp = jnp.zeros((last_pad, cout_pad), jnp.float32).at[:cin_i, :cout_i].set(w)
        ws.append(wp.astype(jnp.bfloat16))
        gs.append(jnp.zeros((cout_pad,), jnp.float32).at[:cout_i].set(params["gamma"][i]))
        betas.append(jnp.zeros((cout_pad,), jnp.float32).at[:cout_i].set(params["beta"][i]))
        couts.append(cout_i)
        last_pad = cout_pad

    cpad_max = max(w.shape[1] for w in ws)
    tm = _choose_tile_m(m_real, Cin, cpad_max, K, vmem_limit, max_tm)
    m_pad = _round_up(m_real, tm)

    # pad M once; X is the only large array that ever travels HBM <-> VMEM
    x_pad = new_fea.reshape(m_real, Cin).astype(jnp.float32)
    if m_pad != m_real:
        x_pad = jnp.pad(x_pad, ((0, m_pad - m_real), (0, 0)))

    scales, shifts = [], []
    gmax = gmin = None
    for i in range(L):
        outs = _run_pass(x_pad, ws, scales, shifts, i, K=K, tm=tm, m_real=m_real,
                         m_pad=m_pad, is_last=(i == L - 1), vmem_limit=vmem_limit)
        mean, var = _combine_block_stats(outs[0], outs[1], tm, m_real)
        scale = gs[i] / jnp.sqrt(var + BN_EPS)
        shift = betas[i] - mean * scale
        scales.append(scale)
        shifts.append(shift)
        if i == L - 1:
            gmax, gmin = outs[2], outs[3]

    # epilogue: max_k relu(y_k*s + t) == relu(s * (max_k y_k if s>0 else min_k y_k) + t)
    BS = B * S
    s_l, t_l = scales[-1][None, :], shifts[-1][None, :]
    sel = jnp.where(s_l > 0, gmax[:BS], gmin[:BS])
    out = jnp.maximum(sel * s_l + t_l, 0.0)
    out = out[:, :couts[-1]].reshape(B, S, couts[-1]).transpose(0, 2, 1)
    return out


def sa_attention_forward(xyz_b3n, points_bdn, params, n_center, n_near):
    # torch forward: xyz (B,3,N), points (B,D,N) -> new_xyz (B,3,S), new_points (B,C_last,S)
    xyz = np.asarray(xyz_b3n, dtype=np.float32).transpose(0, 2, 1)     # (B, N, 3)
    fea = np.asarray(points_bdn, dtype=np.float32).transpose(0, 2, 1)  # (B, N, D)
    new_xyz, new_fea = sa_sample_and_group_np(n_center, n_near, xyz, fea)
    new_points = mlp_max_pallas(jnp.asarray(new_fea), params)
    new_xyz_out = jnp.asarray(new_xyz.transpose(0, 2, 1))
    return new_xyz_out, new_points, new_fea


# ----------------------------------------------------------------------------------
# Reference (mirrors the kernel's mixed-precision dataflow in float64; keeps the
# conv bias -- its omission in the kernel is exactly cancelled by the BN mean).
# ----------------------------------------------------------------------------------
def _bf16_rt(a):
    """Round-trip through bfloat16 (round-to-nearest-even), returned as float64."""
    a32 = jnp.asarray(np.asarray(a, dtype=np.float32))
    return np.asarray(a32.astype(jnp.bfloat16).astype(jnp.float32), dtype=np.float64)


def mlp_max_reference(new_fea, params):
    B, S, K, Cin = new_fea.shape
    M = B * S * K
    a = np.asarray(new_fea, np.float64).reshape(M, Cin)
    for i in range(len(params["w"])):
        W = _bf16_rt(params["w"][i])
        b = np.asarray(params["b"][i], np.float64)
        g = np.asarray(params["gamma"][i], np.float64)
        be = np.asarray(params["beta"][i], np.float64)
        y = _bf16_rt(a) @ W + b
        mean = y.mean(0)
        var = y.var(0)                       # biased, matches BN training mode
        scale = g / np.sqrt(var + BN_EPS)
        shift = be - mean * scale
        a = np.maximum(y * scale + shift, 0.0)
    z = a.reshape(B * S, K, -1).max(axis=1)
    return z.reshape(B, S, -1).transpose(0, 2, 1)


if __name__ == "__main__":
    B, N, D = 2, 32, 5
    n_center, n_near = 12, 8          # M = 2*12*8 = 192 exercises row padding/masking
    mlp = [32, 64]
    in_channel = 3 + D

    key = jax.random.PRNGKey(0)
    k1, k2, kp = jax.random.split(key, 3)
    xyz = jax.random.normal(k1, (B, 3, N), jnp.float32)
    points = jax.random.normal(k2, (B, D, N), jnp.float32)
    params = init_params(kp, in_channel, mlp)

    new_xyz, new_points, new_fea = sa_attention_forward(xyz, points, params, n_center, n_near)
    jax.block_until_ready(new_points)
    jax.block_until_ready(new_xyz)

    assert new_xyz.shape == (B, 3, n_center)
    assert new_points.shape == (B, mlp[-1], n_center)

    ref = mlp_max_reference(new_fea, params)
    # tolerance covers bf16 MXU operands (elementwise / stats math is f32)
    np.testing.assert_allclose(np.asarray(new_points), ref, rtol=2e-2, atol=2e-2)

    # second run with a forced small tile: exercises 3 grid blocks with no row padding
    # (m_real % tm == 0) and the multi-block Welford combine path
    new_points_small = mlp_max_pallas(jnp.asarray(new_fea), params, max_tm=64)
    jax.block_until_ready(new_points_small)
    np.testing.assert_allclose(np.asarray(new_points_small), ref, rtol=2e-2, atol=2e-2)

    print("KERNEL_OK")
</pallas_src>

<mosaic_0001>
module attributes {stable_mosaic.version = 11 : i64} {
  func.func @kernel(%arg0: i32, %arg1: memref<128x8xf32, #tpu.memory_space<vmem>>, %arg2: memref<8x128xbf16, #tpu.memory_space<vmem>>, %arg3: memref<1x1x128xf32, #tpu.memory_space<vmem>>, %arg4: memref<1x1x128xf32, #tpu.memory_space<vmem>>) attributes {dimension_semantics = [#tpu.dimension_semantics<parallel>], iteration_bounds = array<i64: 2>, scalar_prefetch = 0 : i64, scratch_operands = 0 : i64, tpu.core_type = #tpu.core_type<tc>, window_params = [{transform_indices = @transform_0, window_bounds = array<i64: 128, 8>}, {pipeline_mode = #tpu.pipeline_mode<synchronous>, transform_indices = @transform_1, window_bounds = array<i64: 8, 128>}, {transform_indices = @transform_2, window_bounds = array<i64: 1, 1, 128>}, {transform_indices = @transform_3, window_bounds = array<i64: 1, 1, 128>}]} {
    %c0 = arith.constant 0 : index
    %c0_0 = arith.constant 0 : index
    %0 = vector.load %arg1[%c0, %c0_0] : memref<128x8xf32, #tpu.memory_space<vmem>>, vector<128x8xf32>
    %1 = arith.truncf %0 : vector<128x8xf32> to vector<128x8xbf16>
    %c0_1 = arith.constant 0 : index
    %c0_2 = arith.constant 0 : index
    %2 = vector.load %arg2[%c0_1, %c0_2] : memref<8x128xbf16, #tpu.memory_space<vmem>>, vector<8x128xbf16>
    %cst = arith.constant dense<0.000000e+00> : vector<128x128xf32>
    %3 = tpu.matmul %1, %2, %cst {dimension_numbers = #tpu.dot_dimension_numbers<[1], [0], [0], [1], [0, 0, 1, 1], [], []>} : vector<128x8xbf16>, vector<8x128xbf16>, vector<128x128xf32> -> vector<128x128xf32>
    %c128_i32 = arith.constant 128 : i32
    %4 = arith.muli %arg0, %c128_i32 : i32
    %5 = tpu.iota {dimensions = array<i32: 0>} : vector<128x1xi32>
    %6 = vector.broadcast %4 : i32 to vector<128x1xi32>
    %7 = arith.addi %6, %5 : vector<128x1xi32>
    %c192_i32 = arith.constant 192 : i32
    %8 = vector.broadcast %c192_i32 : i32 to vector<128x1xi32>
    %9 = arith.cmpi slt, %7, %8 : vector<128x1xi32>
    %cst_3 = arith.constant 0.000000e+00 : f32
    %10 = vector.shape_cast %9 : vector<128x1xi1> to vector<128x1xi1>
    %11 = vector.broadcast %10 : vector<128x1xi1> to vector<128x128xi1>
    %12 = vector.broadcast %cst_3 : f32 to vector<128x128xf32>
    %13 = arith.select %11, %3, %12 : vector<128x128xi1>, vector<128x128xf32>
    %c128_i32_4 = arith.constant 128 : i32
    %14 = arith.muli %arg0, %c128_i32_4 : i32
    %c192_i32_5 = arith.constant 192 : i32
    %15 = arith.subi %c192_i32_5, %14 : i32
    %c128_i32_6 = arith.constant 128 : i32
    %16 = arith.minsi %c128_i32_6, %15 : i32
    %17 = arith.sitofp %16 : i32 to f32
    %cst_7 = arith.constant dense<0.000000e+00> : vector<128xf32>
    %18 = vector.multi_reduction <add>, %13, %cst_7 [0] : vector<128x128xf32> to vector<128xf32>
    %19 = vector.shape_cast %18 : vector<128xf32> to vector<1x128xf32>
    %20 = vector.broadcast %17 : f32 to vector<1x128xf32>
    %21 = arith.divf %19, %20 : vector<1x128xf32>
    %22 = vector.broadcast %21 : vector<1x128xf32> to vector<128x128xf32>
    %23 = arith.subf %3, %22 : vector<128x128xf32>
    %cst_8 = arith.constant 0.000000e+00 : f32
    %24 = vector.shape_cast %9 : vector<128x1xi1> to vector<128x1xi1>
    %25 = vector.broadcast %24 : vector<128x1xi1> to vector<128x128xi1>
    %26 = vector.broadcast %cst_8 : f32 to vector<128x128xf32>
    %27 = arith.select %25, %23, %26 : vector<128x128xi1>, vector<128x128xf32>
    %28 = arith.mulf %27, %27 : vector<128x128xf32>
    %cst_9 = arith.constant dense<0.000000e+00> : vector<128xf32>
    %29 = vector.multi_reduction <add>, %28, %cst_9 [0] : vector<128x128xf32> to vector<128xf32>
    %30 = vector.shape_cast %29 : vector<128xf32> to vector<1x128xf32>
    %31 = vector.shape_cast %19 : vector<1x128xf32> to vector<1x1x128xf32>
    %c0_10 = arith.constant 0 : index
    %c0_11 = arith.constant 0 : index
    %c0_12 = arith.constant 0 : index
    %32 = vector.load %arg3[%c0_10, %c0_11, %c0_12] : memref<1x1x128xf32, #tpu.memory_space<vmem>>, vector<1x1x128xf32>
    tpu.vector_store %arg3[%c0_10, %c0_11, %c0_12], %31 {strides = array<i32>} : memref<1x1x128xf32, #tpu.memory_space<vmem>>, vector<1x1x128xf32>,
    %33 = vector.shape_cast %30 : vector<1x128xf32> to vector<1x1x128xf32>
    %c0_13 = arith.constant 0 : index
    %c0_14 = arith.constant 0 : index
    %c0_15 = arith.constant 0 : index
    %34 = vector.load %arg4[%c0_13, %c0_14, %c0_15] : memref<1x1x128xf32, #tpu.memory_space<vmem>>, vector<1x1x128xf32>
    tpu.vector_store %arg4[%c0_13, %c0_14, %c0_15], %33 {strides = array<i32>} : memref<1x1x128xf32, #tpu.memory_space<vmem>>, vector<1x1x128xf32>,
    return
  }
  func.func @transform_0(%arg0: i32) -> (i32, i32) {
    %c0_i32 = arith.constant 0 : i32
    %c0_i32_0 = arith.constant 0 : i32
    return %arg0, %c0_i32 : i32, i32
  }
  func.func @transform_1(%arg0: i32) -> (i32, i32) {
    %c0_i32 = arith.constant 0 : i32
    %c0_i32_0 = arith.constant 0 : i32
    %c0_i32_1 = arith.constant 0 : i32
    return %c0_i32, %c0_i32_0 : i32, i32
  }
  func.func @transform_2(%arg0: i32) -> (i32, i32, i32) {
    %c0_i32 = arith.constant 0 : i32
    %c0_i32_0 = arith.constant 0 : i32
    %c0_i32_1 = arith.constant 0 : i32
    return %arg0, %c0_i32, %c0_i32_0 : i32, i32, i32
  }
  func.func @transform_3(%arg0: i32) -> (i32, i32, i32) {
    %c0_i32 = arith.constant 0 : i32
    %c0_i32_0 = arith.constant 0 : i32
    %c0_i32_1 = arith.constant 0 : i32
    return %arg0, %c0_i32, %c0_i32_0 : i32, i32, i32
  }
}

module attributes {stable_mosaic.version = 11 : i64} {
  func.func @kernel(%arg0: i32, %arg1: memref<128x8xf32, #tpu.memory_space<vmem>>, %arg2: memref<1x128xf32, #tpu.memory_space<vmem>>, %arg3: memref<1x128xf32, #tpu.memory_space<vmem>>, %arg4: memref<8x128xbf16, #tpu.memory_space<vmem>>, %arg5: memref<128x128xbf16, #tpu.memory_space<vmem>>, %arg6: memref<1x1x128xf32, #tpu.memory_space<vmem>>, %arg7: memref<1x1x128xf32, #tpu.memory_space<vmem>>, %arg8: memref<16x128xf32, #tpu.memory_space<vmem>>, %arg9: memref<16x128xf32, #tpu.memory_space<vmem>>) attributes {dimension_semantics = [#tpu.dimension_semantics<parallel>], iteration_bounds = array<i64: 2>, scalar_prefetch = 0 : i64, scratch_operands = 0 : i64, tpu.core_type = #tpu.core_type<tc>, window_params = [{transform_indices = @transform_0, window_bounds = array<i64: 128, 8>}, {pipeline_mode = #tpu.pipeline_mode<synchronous>, transform_indices = @transform_1, window_bounds = array<i64: 1, 128>}, {pipeline_mode = #tpu.pipeline_mode<synchronous>, transform_indices = @transform_2, window_bounds = array<i64: 1, 128>}, {pipeline_mode = #tpu.pipeline_mode<synchronous>, transform_indices = @transform_3, window_bounds = array<i64: 8, 128>}, {pipeline_mode = #tpu.pipeline_mode<synchronous>, transform_indices = @transform_4, window_bounds = array<i64: 128, 128>}, {transform_indices = @transform_5, window_bounds = array<i64: 1, 1, 128>}, {transform_indices = @transform_6, window_bounds = array<i64: 1, 1, 128>}, {transform_indices = @transform_7, window_bounds = array<i64: 16, 128>}, {transform_indices = @transform_8, window_bounds = array<i64: 16, 128>}]} {
    %c0 = arith.constant 0 : index
    %c0_0 = arith.constant 0 : index
    %0 = vector.load %arg1[%c0, %c0_0] : memref<128x8xf32, #tpu.memory_space<vmem>>, vector<128x8xf32>
    %1 = arith.truncf %0 : vector<128x8xf32> to vector<128x8xbf16>
    %c0_1 = arith.constant 0 : index
    %c0_2 = arith.constant 0 : index
    %2 = vector.load %arg4[%c0_1, %c0_2] : memref<8x128xbf16, #tpu.memory_space<vmem>>, vector<8x128xbf16>
    %cst = arith.constant dense<0.000000e+00> : vector<128x128xf32>
    %3 = tpu.matmul %1, %2, %cst {dimension_numbers = #tpu.dot_dimension_numbers<[1], [0], [0], [1], [0, 0, 1, 1], [], []>} : vector<128x8xbf16>, vector<8x128xbf16>, vector<128x128xf32> -> vector<128x128xf32>
    %c0_3 = arith.constant 0 : index
    %c0_4 = arith.constant 0 : index
    %4 = vector.load %arg2[%c0_3, %c0_4] : memref<1x128xf32, #tpu.memory_space<vmem>>, vector<1x128xf32>
    %5 = vector.broadcast %4 : vector<1x128xf32> to vector<128x128xf32>
    %6 = arith.mulf %3, %5 : vector<128x128xf32>
    %c0_5 = arith.constant 0 : index
    %c0_6 = arith.constant 0 : index
    %7 = vector.load %arg3[%c0_5, %c0_6] : memref<1x128xf32, #tpu.memory_space<vmem>>, vector<1x128xf32>
    %8 = vector.broadcast %7 : vector<1x128xf32> to vector<128x128xf32>
    %9 = arith.addf %6, %8 : vector<128x128xf32>
    %cst_7 = arith.constant 0.000000e+00 : f32
    %10 = vector.broadcast %cst_7 : f32 to vector<128x128xf32>
    %11 = arith.maximumf %9, %10 : vector<128x128xf32>
    %12 = arith.truncf %11 : vector<128x128xf32> to vector<128x128xbf16>
    %c0_8 = arith.constant 0 : index
    %c0_9 = arith.constant 0 : index
    %13 = vector.load %arg5[%c0_8, %c0_9] : memref<128x128xbf16, #tpu.memory_space<vmem>>, vector<128x128xbf16>
    %cst_10 = arith.constant dense<0.000000e+00> : vector<128x128xf32>
    %14 = tpu.matmul %12, %13, %cst_10 {dimension_numbers = #tpu.dot_dimension_numbers<[1], [0], [0], [1], [0, 0, 1, 1], [], []>} : vector<128x128xbf16>, vector<128x128xbf16>, vector<128x128xf32> -> vector<128x128xf32>
    %c128_i32 = arith.constant 128 : i32
    %15 = arith.muli %arg0, %c128_i32 : i32
    %16 = tpu.iota {dimensions = array<i32: 0>} : vector<128x1xi32>
    %17 = vector.broadcast %15 : i32 to vector<128x1xi32>
    %18 = arith.addi %17, %16 : vector<128x1xi32>
    %c192_i32 = arith.constant 192 : i32
    %19 = vector.broadcast %c192_i32 : i32 to vector<128x1xi32>
    %20 = arith.cmpi slt, %18, %19 : vector<128x1xi32>
    %cst_11 = arith.constant 0.000000e+00 : f32
    %21 = vector.shape_cast %20 : vector<128x1xi1> to vector<128x1xi1>
    %22 = vector.broadcast %21 : vector<128x1xi1> to vector<128x128xi1>
    %23 = vector.broadcast %cst_11 : f32 to vector<128x128xf32>
    %24 = arith.select %22, %14, %23 : vector<128x128xi1>, vector<128x128xf32>
    %c128_i32_12 = arith.constant 128 : i32
    %25 = arith.muli %arg0, %c128_i32_12 : i32
    %c192_i32_13 = arith.constant 192 : i32
    %26 = arith.subi %c192_i32_13, %25 : i32
    %c128_i32_14 = arith.constant 128 : i32
    %27 = arith.minsi %c128_i32_14, %26 : i32
    %28 = arith.sitofp %27 : i32 to f32
    %cst_15 = arith.constant dense<0.000000e+00> : vector<128xf32>
    %29 = vector.multi_reduction <add>, %24, %cst_15 [0] : vector<128x128xf32> to vector<128xf32>
    %30 = vector.shape_cast %29 : vector<128xf32> to vector<1x128xf32>
    %31 = vector.broadcast %28 : f32 to vector<1x128xf32>
    %32 = arith.divf %30, %31 : vector<1x128xf32>
    %33 = vector.broadcast %32 : vector<1x128xf32> to vector<128x128xf32>
    %34 = arith.subf %14, %33 : vector<128x128xf32>
    %cst_16 = arith.constant 0.000000e+00 : f32
    %35 = vector.shape_cast %20 : vector<128x1xi1> to vector<128x1xi1>
    %36 = vector.broadcast %35 : vector<128x1xi1> to vector<128x128xi1>
    %37 = vector.broadcast %cst_16 : f32 to vector<128x128xf32>
    %38 = arith.select %36, %34, %37 : vector<128x128xi1>, vector<128x128xf32>
    %39 = arith.mulf %38, %38 : vector<128x128xf32>
    %cst_17 = arith.constant dense<0.000000e+00> : vector<128xf32>
    %40 = vector.multi_reduction <add>, %39, %cst_17 [0] : vector<128x128xf32> to vector<128xf32>
    %41 = vector.shape_cast %40 : vector<128xf32> to vector<1x128xf32>
    %42 = vector.shape_cast %30 : vector<1x128xf32> to vector<1x1x128xf32>
    %c0_18 = arith.constant 0 : index
    %c0_19 = arith.constant 0 : index
    %c0_20 = arith.constant 0 : index
    %43 = vector.load %arg6[%c0_18, %c0_19, %c0_20] : memref<1x1x128xf32, #tpu.memory_space<vmem>>, vector<1x1x128xf32>
    tpu.vector_store %arg6[%c0_18, %c0_19, %c0_20], %42 {strides = array<i32>} : memref<1x1x128xf32, #tpu.memory_space<vmem>>, vector<1x1x128xf32>,
    %44 = vector.shape_cast %41 : vector<1x128xf32> to vector<1x1x128xf32>
    %c0_21 = arith.constant 0 : index
    %c0_22 = arith.constant 0 : index
    %c0_23 = arith.constant 0 : index
    %45 = vector.load %arg7[%c0_21, %c0_22, %c0_23] : memref<1x1x128xf32, #tpu.memory_space<vmem>>, vector<1x1x128xf32>
    tpu.vector_store %arg7[%c0_21, %c0_22, %c0_23], %44 {strides = array<i32>} : memref<1x1x128xf32, #tpu.memory_space<vmem>>, vector<1x1x128xf32>,
    %46 = vector.shape_cast %14 : vector<128x128xf32> to vector<16x8x128xf32>
    %cst_24 = arith.constant dense<0xFF800000> : vector<16x128xf32>
    %47 = vector.multi_reduction <maximumf>, %46, %cst_24 [1] : vector<16x8x128xf32> to vector<16x128xf32>
    %c0_25 = arith.constant 0 : index
    %c0_26 = arith.constant 0 : index
    %48 = vector.load %arg8[%c0_25, %c0_26] : memref<16x128xf32, #tpu.memory_space<vmem>>, vector<16x128xf32>
    tpu.vector_store %arg8[%c0_25, %c0_26], %47 {strides = array<i32>} : memref<16x128xf32, #tpu.memory_space<vmem>>, vector<16x128xf32>,
    %cst_27 = arith.constant dense<0x7F800000> : vector<16x128xf32>
    %49 = vector.multi_reduction <minimumf>, %46, %cst_27 [1] : vector<16x8x128xf32> to vector<16x128xf32>
    %c0_28 = arith.constant 0 : index
    %c0_29 = arith.constant 0 : index
    %50 = vector.load %arg9[%c0_28, %c0_29] : memref<16x128xf32, #tpu.memory_space<vmem>>, vector<16x128xf32>
    tpu.vector_store %arg9[%c0_28, %c0_29], %49 {strides = array<i32>} : memref<16x128xf32, #tpu.memory_space<vmem>>, vector<16x128xf32>,
    return
  }
  func.func @transform_0(%arg0: i32) -> (i32, i32) {
    %c0_i32 = arith.constant 0 : i32
    %c0_i32_0 = arith.constant 0 : i32
    return %arg0, %c0_i32 : i32, i32
  }
  func.func @transform_1(%arg0: i32) -> (i32, i32) {
    %c0_i32 = arith.constant 0 : i32
    %c0_i32_0 = arith.constant 0 : i32
    %c0_i32_1 = arith.constant 0 : i32
    return %c0_i32, %c0_i32_0 : i32, i32
  }
  func.func @transform_2(%arg0: i32) -> (i32, i32) {
    %c0_i32 = arith.constant 0 : i32
    %c0_i32_0 = arith.constant 0 : i32
    %c0_i32_1 = arith.constant 0 : i32
    return %c0_i32, %c0_i32_0 : i32, i32
  }
  func.func @transform_3(%arg0: i32) -> (i32, i32) {
    %c0_i32 = arith.constant 0 : i32
    %c0_i32_0 = arith.constant 0 : i32
    %c0_i32_1 = arith.constant 0 : i32
    return %c0_i32, %c0_i32_0 : i32, i32
  }
  func.func @transform_4(%arg0: i32) -> (i32, i32) {
    %c0_i32 = arith.constant 0 : i32
    %c0_i32_0 = arith.constant 0 : i32
    %c0_i32_1 = arith.constant 0 : i32
    return %c0_i32, %c0_i32_0 : i32, i32
  }
  func.func @transform_5(%arg0: i32) -> (i32, i32, i32) {
    %c0_i32 = arith.constant 0 : i32
    %c0_i32_0 = arith.constant 0 : i32
    %c0_i32_1 = arith.constant 0 : i32
    return %arg0, %c0_i32, %c0_i32_0 : i32, i32, i32
  }
  func.func @transform_6(%arg0: i32) -> (i32, i32, i32) {
    %c0_i32 = arith.constant 0 : i32
    %c0_i32_0 = arith.constant 0 : i32
    %c0_i32_1 = arith.constant 0 : i32
    return %arg0, %c0_i32, %c0_i32_0 : i32, i32, i32
  }
  func.func @transform_7(%arg0: i32) -> (i32, i32) {
    %c0_i32 = arith.constant 0 : i32
    %c0_i32_0 = arith.constant 0 : i32
    return %arg0, %c0_i32 : i32, i32
  }
  func.func @transform_8(%arg0: i32) -> (i32, i32) {
    %c0_i32 = arith.constant 0 : i32
    %c0_i32_0 = arith.constant 0 : i32
    return %arg0, %c0_i32 : i32, i32
  }
}

</mosaic_0001>

<bundles_post_ra>
// kernel: mlp_max_pallas.2
= control target key start
LH: loop header
LB: loop body
LE: loop exit
PB: predicated region body
PF: predicated region fallthrough
CT: control target
= control target key end

     0   :  { %s687_s12 = smov 0   ;;  %s944_s0 = inlined_call_operand.vmem [shape: f32[256,8], index: 0, kind: input, shape index: {}]   ;;  %s945_s1 = inlined_call_operand.vmem [shape: bf16[8,128], index: 1, kind: input, shape index: {}]   ;;  %s946_s2 = inlined_call_operand.vmem [shape: f32[2,1,128], index: 2, kind: output, shape index: {0}]   ;;  %s947_s3 = inlined_call_operand.vmem [shape: f32[2,1,128], index: 3, kind: output, shape index: {1}]  }
   0x1 LB: > { %s693_s13 = sadd.s32 4294967295, %s665_s12   ;;  %p604_p0 = scmp.ge.s32.totalorder %s665_s12, 1  ;;  %s665_s12 = sphi %s687_s12, %s14_s12  }
   0x2   : > { %p141_p1 = scmp.lt.s32.totalorder %s665_s12, 3 }
   0x4   : > { %p142_p2 = pnand %p604_p0, %p141_p1 }
   0x5   : > { %v203_v0 = vld [vmem:[%s945_s1] sm:$0xf] (!%p142_p2)  ;;  %vm229_vm0 = vcmask (!%p142_p2), 1043456   ;;  %s605_s16 = sshll.u32 (!%p142_p2), %s693_s13, 4  ;;  %vm204_vm1 = vcmask (!%p142_p2), 64512   ;;  %v331_v26 = vlaneseq (!%p142_p2)  ;;  %s615_s21 = sshll.u32 (!%p142_p2), %s693_s13, 7 }
   0x6   : > { %145 = sbr.rel (%p142_p2) target bundleno = 330 (0x14a), region = 28  ;;  %647 = vmatprep.subr.msk.bf16.mxu0 (!%p142_p2), %vm229_vm0, %v203_v0  ;;  %v231_v1 = vsel (!%p142_p2), %vm229_vm0, %v203_v0, 0  ;;  %p167_p3 = scmp.lt.s32.totalorder (!%p142_p2), %s605_s16, 31  ;;  %648 = vmatprep.subr.msk.bf16.mxu1 (!%p142_p2), %vm229_vm0, %v203_v0  ;;  %v718_v29 = vstv (!%p142_p2), %s615_s21 }
   0x7   : > { %628 = vmatpush3.bf16.msra.mxu0 (!%p142_p2), %v231_v1  ;;  %646 = vmatpush3.bf16.msra.mxu1 (!%p142_p2), %v231_v1  ;;  %v713_v27 = vshrl.u32 (!%p142_p2), %v331_v26, 7  ;;  %s429_s22 = ssub.s32 (!%p142_p2), 192, %s615_s21  ;;  %p172_p5 = scmp.lt.s32.totalorder (!%p142_p2), %s693_s13, 1 }
   0x8   : > { %p430_p4 = scmp.lt.s32.totalorder (!%p142_p2), %s429_s22, 128 }
   0x9   : > { %v333_v28 = vadd.s32 (!%p142_p2), 8, %v713_v27  ;;  %v334_v30 = vadd.s32 (!%p142_p2), 16, %v713_v27  ;;  %v723_v31 = vadd.s32 (!%p142_p2), %v718_v29, %v713_v27  ;;  %v335_v32 = vadd.s32 (!%p142_p2), 24, %v713_v27 }
   0xa   : > { %v336_v35 = vadd.s32 (!%p142_p2), 32, %v713_v27  ;;  %v337_v39 = vadd.s32 (!%p142_p2), 40, %v713_v27  ;;  %v338_v42 = vadd.s32 (!%p142_p2), 48, %v713_v27  ;;  %v339_v47 = vadd.s32 (!%p142_p2), 56, %v713_v27 }
   0xb   : > { %v727_v33 = vadd.s32 (!%p142_p2), %v718_v29, %v333_v28  ;;  %v730_v34 = vadd.s32 (!%p142_p2), %v718_v29, %v334_v30  ;;  %vm365_vm2 = vcmp.lt.s32.totalorder (!%p142_p2), %v723_v31, 192  ;;  %v739_v38 = vadd.s32 (!%p142_p2), %v718_v29, %v335_v32 }
   0xc   : > { %v750_v43 = vadd.s32 (!%p142_p2), %v718_v29, %v336_v35  ;;  %v765_v50 = vadd.s32 (!%p142_p2), %v718_v29, %v337_v39  ;;  %v340_v51 = vadd.s32 (!%p142_p2), 64, %v713_v27  ;;  %v776_v56 = vadd.s32 (!%p142_p2), %v718_v29, %v338_v42 }
   0xd   : > { %s949_s16 = smov (!%p167_p3, %s605_s16), 31  ;;  %vm366_vm3 = vcmp.lt.s32.totalorder %v727_v33, 192  ;;  %vm367_vm4 = vcmp.lt.s32.totalorder %v730_v34, 192  ;;  %vm368_vm5 = vcmp.lt.s32.totalorder %v739_v38, 192  ;;  %v785_v59 = vadd.s32 %v718_v29, %v339_v47  ;;  %s951_s22 = smov (!%p430_p4, %s429_s22), 128 }
   0xe   : > { %s606_s17 = sshll.u32 %s949_s16, 3  ;;  %vm369_vm6 = vcmp.lt.s32.totalorder %v750_v43, 192  ;;  %vm370_vm7 = vcmp.lt.s32.totalorder %v765_v50, 192  ;;  %v791_v62 = vadd.s32 %v718_v29, %v340_v51  ;;  %v341_v63 = vadd.s32 72, %v713_v27  ;;  %s432_s23 = scvt.s32.f32 %s951_s22 }
   0xf   : > { %s170_s20 = scalar_lea.vmem %s944_s0, %s606_s17  ;;  %vm371_vm8 = vcmp.lt.s32.totalorder %v776_v56, 192  ;;  %vm372_vm9 = vcmp.lt.s32.totalorder %v785_v59, 192  ;;  %v347_v28 = vadd.s32 120, %v713_v27  ;;  %s953_s13 = smov (!%p172_p5, %s693_s13), 1 }
  0x10   : > { %v179_v2 = vld [vmem:[%s170_s20] sm:$0xff]  ;;  %v180_v3 = vld [vmem:[%s170_s20 + $0x8] sm:$0xff]  ;;  %v181_v4 = vld [vmem:[%s170_s20 + $0x10] sm:$0xff]  ;;  %vm373_vm10 = vcmp.lt.s32.totalorder %v791_v62, 192  ;;  %s174_s26 = scalar_lea.vmem %s946_s2, %s953_s13  ;;  %s177_s29 = scalar_lea.vmem %s947_s3, %s953_s13 }
  0x11   : > { %v195_v5 = vpack.c.bf16 %v180_v3, %v179_v2  ;;  %v182_v6 = vld [vmem:[%s170_s20 + $0x18] sm:$0xff]  ;;  %v183_v7 = vld [vmem:[%s170_s20 + $0x20] sm:$0xff]  ;;  %v184_v8 = vld [vmem:[%s170_s20 + $0x28] sm:$0xff] }
  0x12   : > { %v196_v9 = vpack.c.bf16 %v182_v6, %v181_v4  ;;  %v197_v10 = vpack.c.bf16 %v184_v8, %v183_v7  ;;  %v187_v11 = vld [vmem:[%s170_s20 + $0x40] sm:$0xff]  ;;  %v188_v12 = vld [vmem:[%s170_s20 + $0x48] sm:$0xff]  ;;  %v189_v13 = vld [vmem:[%s170_s20 + $0x50] sm:$0xff]  ;;  %v342_v4 = vadd.s32 80, %v713_v27  ;;  %v343_v7 = vadd.s32 88, %v713_v27 }
  0x13   : > { %629 = vmatprep.mubr.msk.bf16.mxu0 %vm204_vm1, %v195_v5  ;;  %v190_v14 = vld [vmem:[%s170_s20 + $0x58] sm:$0xff]  ;;  %v199_v15 = vpack.c.bf16 %v188_v12, %v187_v11  ;;  %v191_v17 = vld [vmem:[%s170_s20 + $0x60] sm:$0xff]  ;;  %v192_v18 = vld [vmem:[%s170_s20 + $0x68] sm:$0xff]  ;;  %v344_v11 = vadd.s32 96, %v713_v27 }
  0x14   : > { %630 = vmatmul.mubr.msk.bf16.vlgmr.msra.gmra.mrb[0].mxu0 %vm204_vm1, %v196_v9  ;;  %v200_v16 = vpack.c.bf16 %v190_v14, %v189_v13  ;;  %v185_v19 = vld [vmem:[%s170_s20 + $0x30] sm:$0xff]  ;;  %v186_v20 = vld [vmem:[%s170_s20 + $0x38] sm:$0xff]  ;;  %v201_v21 = vpack.c.bf16 %v192_v18, %v191_v17 }
  0x15   : > { %633 = vmatprep.mubr.msk.bf16.mxu0 %vm204_vm1, %v197_v10  ;;  %637 = vmatprep.mubr.msk.bf16.mxu1 %vm204_vm1, %v199_v15  ;;  %v198_v22 = vpack.c.bf16 %v186_v20, %v185_v19  ;;  %v193_v23 = vld [vmem:[%s170_s20 + $0x70] sm:$0xff]  ;;  %v194_v24 = vld [vmem:[%s170_s20 + $0x78] sm:$0xff]  ;;  %v814_v10 = vadd.s32 %v718_v29, %v341_v63  ;;  %v834_v19 = vadd.s32 %v718_v29, %v343_v7 }
  0x16   : > { %638 = vmatmul.mubr.msk.bf16.vlgmr.msra.gmra.mrb[0].mxu1 %vm204_vm1, %v200_v16  ;;  %v202_v25 = vpack.c.bf16 %v194_v24, %v193_v23  ;;  %v825_v16 = vadd.s32 %v718_v29, %v342_v4  ;;  %v346_v24 = vadd.s32 112, %v713_v27 }
  0x17   : > { %641 = vmatprep.mubr.msk.bf16.mxu1 %vm204_vm1, %v201_v21  ;;  %vm374_vm11 = vcmp.lt.s32.totalorder %v814_v10, 192  ;;  %v840_v21 = vadd.s32 %v718_v29, %v344_v11  ;;  %vm376_vm13 = vcmp.lt.s32.totalorder %v834_v19, 192 }
  0x18   : > { %vm375_vm12 = vcmp.lt.s32.totalorder %v825_v16, 192  ;;  %v858_v39 = vadd.s32 %v718_v29, %v346_v24 }
  0x19   : > { %vm377_vm14 = vcmp.lt.s32.totalorder %v840_v21, 192 }
  0x1a   : > { %vm379_vm0 = vcmp.lt.s32.totalorder %v858_v39, 192 }
  0x1c   : > { %634 = vmatmul.mubr.msk.bf16.gmra.mrb[4].mxu0 %vm204_vm1, %v198_v22  ;;  %v345_v22 = vadd.s32 104, %v713_v27 }
  0x1e   : > { %642 = vmatmul.mubr.msk.bf16.gmra.mrb[4].mxu1 %vm204_vm1, %v202_v25  ;;  %v852_v30 = vadd.s32 %v718_v29, %v345_v22 }
  0x20   : > { %vm378_vm15 = vcmp.lt.s32.totalorder %v852_v30, 192 }
  0xe7   : > { %v733_v36 = vpop.f32.mrb[0].mxu0 }
  0xe8   : > { %v735_v37 = vpop.f32.mrb[1].mxu0  ;;  %v415_v53 = vsel %vm367_vm4, %v733_v36, 0.0 }
  0xe9   : > { %v743_v40 = vpop.f32.mrb[2].mxu0  ;;  %v752_v44 = vpop.f32.mrb[0].mxu1  ;;  %v413_v45 = vsel %vm365_vm2, %v735_v37, 0.0 }
  0xea   : > { %v746_v41 = vpop.f32.mrb[3].mxu0  ;;  %v761_v48 = vpop.f32.mrb[1].mxu1  ;;  %v416_v57 = vsel %vm368_vm5, %v743_v40, 0.0  ;;  %v423_v32 = vsel %vm375_vm12, %v752_v44, 0.0 }
  0xeb   : > { %v414_v46 = vsel %vm366_vm3, %v746_v41, 0.0  ;;  %v768_v52 = vpop.f32.mrb[2].mxu1  ;;  %v421_v18 = vsel %vm373_vm10, %v761_v48, 0.0 }
  0xec   : > { %v433_v49 = vadd.f32 %v414_v46, %v413_v45  ;;  %v773_v54 = vpop.f32.mrb[3].mxu1  ;;  %v424_v42 = vsel %vm376_vm13, %v768_v52, 0.0  ;;  %v867_v46 = vadd.s32 %v718_v29, %v347_v28 }
  0xed   : > { %v422_v25 = vsel %vm374_vm11, %v773_v54, 0.0 }
  0xee   : > { %v434_v55 = vadd.f32 %v433_v49, %v415_v53  ;;  %vm380_vm1 = vcmp.lt.s32.totalorder %v867_v46, 192 }
  0xef   : > { %v782_v58 = vpop.f32.mrb[4].mxu0 }
  0xf0   : > { %v787_v60 = vpop.f32.mrb[5].mxu0  ;;  %v435_v61 = vadd.f32 %v434_v55, %v416_v57  ;;  %v419_v13 = vsel %vm371_vm8, %v782_v58, 0.0  ;;  %v454_v55 = vstv %s432_s23 }
  0xf1   : > { %v417_v0 = vsel %vm369_vm6, %v787_v60, 0.0  ;;  %v797_v1 = vpop.f32.mrb[6].mxu0  ;;  %v803_v5 = vpop.f32.mrb[4].mxu1  ;;  %657 = vrcp.f32 %v454_v55 }
  0xf2   : > { %v436_v2 = vadd.f32 %v435_v61, %v417_v0  ;;  %v800_v3 = vpop.f32.mrb[7].mxu0  ;;  %v810_v8 = vpop.f32.mrb[5].mxu1  ;;  %v420_v17 = vsel %vm372_vm9, %v797_v1, 0.0  ;;  %v427_v53 = vsel %vm379_vm0, %v803_v5, 0.0 }
  0xf3   : > { %v418_v6 = vsel %vm370_vm7, %v800_v3, 0.0  ;;  %v817_v12 = vpop.f32.mrb[6].mxu1  ;;  %v425_v27 = vsel %vm377_vm14, %v810_v8, 0.0 }
  0xf4   : > { %v437_v9 = vadd.f32 %v436_v2, %v418_v6  ;;  %v822_v14 = vpop.f32.mrb[7].mxu1  ;;  %v428_v57 = vsel %vm380_vm1, %v817_v12, 0.0 }
  0xf5   : > { %v426_v49 = vsel %vm378_vm15, %v822_v14, 0.0 }
  0xf6   : > { %v438_v15 = vadd.f32 %v437_v9, %v419_v13 }
  0xf8   : > { %v439_v20 = vadd.f32 %v438_v15, %v420_v17 }
  0xfa   : > { %v440_v23 = vadd.f32 %v439_v20, %v421_v18 }
  0xfb   : > { %v658_v7 = vpop.eup %657 }
  0xfc   : > { %v441_v26 = vadd.f32 %v440_v23, %v422_v25 }
  0xfe   : > { %v442_v35 = vadd.f32 %v441_v26, %v423_v32 }
 0x100   : > { %v443_v45 = vadd.f32 %v442_v35, %v424_v42 }
 0x102   : > { %v444_v47 = vadd.f32 %v443_v45, %v425_v27 }
 0x104   : > { %v445_v51 = vadd.f32 %v444_v47, %v426_v49 }
 0x106   : > { %v446_v29 = vadd.f32 %v445_v51, %v427_v53 }
 0x108   : > { %v447_v61 = vadd.f32 %v446_v29, %v428_v57 }
 0x10a   : > { %v448_v63 = vrot.slane %v447_v61, 4 }
 0x10c   : > { %v449_v0 = vadd.f32 %v448_v63, %v447_v61 }
 0x10e   : > { %v450_v2 = vrot.slane %v449_v0, 2 }
 0x110   : > { %v451_v4 = vadd.f32 %v450_v2, %v449_v0 }
 0x112   : > { %v452_v6 = vrot.slane %v451_v4, 1 }
 0x114   : > { %v453_v9 = vadd.f32 %v452_v6, %v451_v4 }
 0x116   : > { %v456_v11 = vmul.f32 %v658_v7, %v453_v9  ;;  %526 = vst [vmem:[%s174_s26] sm:$0x1] %v453_v9 }
 0x118   : > { %v457_v13 = vsub.f32 %v735_v37, %v456_v11  ;;  %v458_v15 = vsub.f32 %v746_v41, %v456_v11  ;;  %v459_v17 = vsub.f32 %v733_v36, %v456_v11  ;;  %v460_v18 = vsub.f32 %v743_v40, %v456_v11 }
 0x119   : > { %v461_v20 = vsub.f32 %v787_v60, %v456_v11  ;;  %v462_v22 = vsub.f32 %v800_v3, %v456_v11  ;;  %v463_v23 = vsub.f32 %v782_v58, %v456_v11  ;;  %v464_v24 = vsub.f32 %v797_v1, %v456_v11 }
 0x11a   : > { %v465_v25 = vsub.f32 %v761_v48, %v456_v11  ;;  %v466_v26 = vsub.f32 %v773_v54, %v456_v11  ;;  %v467_v37 = vsub.f32 %v752_v44, %v456_v11  ;;  %v468_v41 = vsub.f32 %v768_v52, %v456_v11 }
 0x11b   : > { %v469_v36 = vsub.f32 %v810_v8, %v456_v11  ;;  %v470_v40 = vsub.f32 %v822_v14, %v456_v11  ;;  %v471_v60 = vsub.f32 %v803_v5, %v456_v11  ;;  %v472_v3 = vsub.f32 %v817_v12, %v456_v11 }
 0x11c   : > { %v473_v58 = vsel %vm365_vm2, %v457_v13, 0.0  ;;  %v474_v48 = vsel %vm366_vm3, %v458_v15, 0.0  ;;  %v475_v44 = vsel %vm367_vm4, %v459_v17, 0.0  ;;  %v476_v52 = vsel %vm368_vm5, %v460_v18, 0.0 }
 0x11d   : > { %v489_v1 = vmul.f32 %v473_v58, %v473_v58  ;;  %v490_v54 = vmul.f32 %v474_v48, %v474_v48  ;;  %v491_v8 = vmul.f32 %v475_v44, %v475_v44  ;;  %v477_v5 = vsel %vm369_vm6, %v461_v20, 0.0 }
 0x11e   : > { %v492_v12 = vmul.f32 %v476_v52, %v476_v52  ;;  %v478_v31 = vsel %vm370_vm7, %v462_v22, 0.0  ;;  %v493_v33 = vmul.f32 %v477_v5, %v477_v5  ;;  %v479_v35 = vsel %vm371_vm8, %v463_v23, 0.0 }
 0x11f   : > { %v505_v14 = vadd.f32 %v490_v54, %v489_v1  ;;  %v494_v34 = vmul.f32 %v478_v31, %v478_v31  ;;  %v480_v38 = vsel %vm372_vm9, %v464_v24, 0.0  ;;  %v495_v27 = vmul.f32 %v479_v35, %v479_v35 }
 0x120   : > { %v481_v43 = vsel %vm373_vm10, %v465_v25, 0.0  ;;  %v496_v47 = vmul.f32 %v480_v38, %v480_v38  ;;  %v482_v50 = vsel %vm374_vm11, %v466_v26, 0.0  ;;  %v483_v56 = vsel %vm375_vm12, %v467_v37, 0.0 }
 0x121   : > { %v506_v28 = vadd.f32 %v505_v14, %v491_v8  ;;  %v497_v51 = vmul.f32 %v481_v43, %v481_v43  ;;  %v498_v29 = vmul.f32 %v482_v50, %v482_v50  ;;  %v484_v59 = vsel %vm376_vm13, %v468_v41, 0.0 }
 0x122   : > { %v499_v57 = vmul.f32 %v483_v56, %v483_v56  ;;  %v485_v62 = vsel %vm377_vm14, %v469_v36, 0.0  ;;  %v500_v63 = vmul.f32 %v484_v59, %v484_v59  ;;  %v486_v10 = vsel %vm378_vm15, %v470_v40, 0.0 }
 0x123   : > { %v507_v32 = vadd.f32 %v506_v28, %v492_v12  ;;  %v501_v2 = vmul.f32 %v485_v62, %v485_v62  ;;  %v487_v16 = vsel %vm379_vm0, %v471_v60, 0.0  ;;  %v502_v6 = vmul.f32 %v486_v10, %v486_v10 }
 0x124   : > { %v488_v19 = vsel %vm380_vm1, %v472_v3, 0.0  ;;  %v503_v9 = vmul.f32 %v487_v16, %v487_v16 }
 0x125   : > { %v508_v42 = vadd.f32 %v507_v32, %v493_v33  ;;  %v504_v21 = vmul.f32 %v488_v19, %v488_v19 }
 0x127   : > { %v509_v45 = vadd.f32 %v508_v42, %v494_v34 }
 0x129   : > { %v510_v49 = vadd.f32 %v509_v45, %v495_v27 }
 0x12b   : > { %v511_v53 = vadd.f32 %v510_v49, %v496_v47 }
 0x12d   : > { %v512_v55 = vadd.f32 %v511_v53, %v497_v51 }
 0x12f   : > { %v513_v61 = vadd.f32 %v512_v55, %v498_v29 }
 0x131   : > { %v514_v0 = vadd.f32 %v513_v61, %v499_v57 }
 0x133   : > { %v515_v4 = vadd.f32 %v514_v0, %v500_v63 }
 0x135   : > { %v516_v7 = vadd.f32 %v515_v4, %v501_v2 }
 0x137   : > { %v517_v11 = vadd.f32 %v516_v7, %v502_v6 }
 0x139   : > { %v518_v13 = vadd.f32 %v517_v11, %v503_v9 }
 0x13b   : > { %v519_v15 = vadd.f32 %v518_v13, %v504_v21 }
 0x13d   : > { %v520_v17 = vrot.slane %v519_v15, 4 }
 0x13f   : > { %v521_v18 = vadd.f32 %v520_v17, %v519_v15 }
 0x141   : > { %v522_v30 = vrot.slane %v521_v18, 2 }
 0x143   : > { %v523_v20 = vadd.f32 %v522_v30, %v521_v18 }
 0x145   : > { %v524_v22 = vrot.slane %v523_v20, 1 }
 0x147   : > { %v525_v39 = vadd.f32 %v524_v22, %v523_v20 }
 0x149   : > { %527 = vst [vmem:[%s177_s29] sm:$0x1] %v525_v39 }
 0x14a PF: > { %s14_s12 = sadd.s32 1, %s665_s12  }
 0x14b   : > { %p11_p6 = scmp.ge.s32.totalorder %s14_s12, 4  }
 0x14d   :  { %13 = sbr.rel (!%p11_p6) target bundleno = 1 (0x1), region = 70 }

// kernel: mlp_max_pallas.3
= control target key start
LH: loop header
LB: loop body
LE: loop exit
PB: predicated region body
PF: predicated region fallthrough
CT: control target
= control target key end

     0   :  { %s1522_s27 = smov 0   ;;  %s1973_s0 = inlined_call_operand.vmem [shape: f32[256,8], index: 0, kind: input, shape index: {}]   ;;  %s1974_s1 = inlined_call_operand.vmem [shape: f32[1,128], index: 1, kind: input, shape index: {}]   ;;  %s1975_s2 = inlined_call_operand.vmem [shape: f32[1,128], index: 2, kind: input, shape index: {}]   ;;  %s1976_s3 = inlined_call_operand.vmem [shape: bf16[8,128], index: 3, kind: input, shape index: {}]   ;;  %s1977_s4 = inlined_call_operand.vmem [shape: bf16[128,128], index: 4, kind: input, shape index: {}]   ;;  %s1978_s5 = inlined_call_operand.vmem [shape: f32[2,1,128], index: 5, kind: output, shape index: {0}]   ;;  %s1979_s6 = inlined_call_operand.vmem [shape: f32[2,1,128], index: 6, kind: output, shape index: {1}]   ;;  %s1980_s7 = inlined_call_operand.vmem [shape: f32[32,128], index: 7, kind: output, shape index: {2}]   ;;  %s1981_s8 = inlined_call_operand.vmem [shape: f32[32,128], index: 8, kind: output, shape index: {3}]  }
   0x1 LB: > { %s1528_s28 = sadd.s32 4294967295, %s1475_s27   ;;  %p1331_p0 = scmp.ge.s32.totalorder %s1475_s27, 1  ;;  %s1475_s27 = sphi %s1522_s27, %s19_s27  }
   0x2   : > { %p270_p1 = scmp.lt.s32.totalorder %s1475_s27, 3 }
   0x4   : > { %p271_p2 = pnand %p1331_p0, %p270_p1 }
   0x6   : > { %274 = sbr.rel (%p271_p2) target bundleno = 585 (0x249), region = 40 }
   0xd   : > { %v364_v0 = vld [vmem:[%s1976_s3] sm:$0xf]  ;;  %vm390_vm0 = vcmask 1043456   ;;  %s1332_s9 = sshll.u32 %s1528_s28, 4  ;;  %v1460_v3 = vld [vmem:[%s1977_s4 + $0x8] sm:$0xff]   ;;  %v1461_v4 = vld [vmem:[%s1977_s4 + $0x10] sm:$0xff]  }
   0xe   : > { %v1459_v1 = vld [vmem:[%s1977_s4] sm:$0xff]   ;;  %1450 = vmatprep.subr.msk.bf16.mxu0 %vm390_vm0, %v364_v0  ;;  %v392_v2 = vsel %vm390_vm0, %v364_v0, 0  ;;  %p316_p3 = scmp.lt.s32.totalorder %s1332_s9, 31  ;;  %vm365_vm1 = vcmask 64512   ;;  %v1462_v15 = vld [vmem:[%s1977_s4 + $0x18] sm:$0xff]   ;;  %v1464_v31 = vld [vmem:[%s1977_s4 + $0x28] sm:$0xff]  }
   0xf   : > { %1385 = vmatpush3.bf16.msra.mxu0 %v392_v2  ;;  %1434 = vmatprep.subr.bf16.mxu1 %v1459_v1  ;;  %v1463_v19 = vld [vmem:[%s1977_s4 + $0x20] sm:$0xff]   ;;  %v1465_v32 = vld [vmem:[%s1977_s4 + $0x30] sm:$0xff]   ;;  %v1466_v33 = vld [vmem:[%s1977_s4 + $0x38] sm:$0xff]   ;;  %vm1032_vm7 = vcmask 1041409   ;;  %vm1034_vm8 = vcmask 1042434   ;;  %vm1036_vm9 = vcmask 1043459  }
  0x10   : > { %s2008_s9 = smov (!%p316_p3, %s1332_s9), 31  ;;  %1402 = vmatprep.subr.bf16.mxu0 %v1459_v1  ;;  %1442 = vmatpush3.bf16.msra.mxu1 %v1459_v1  ;;  %v1592_v34 = vld [vmem:[%s1974_s1] ss:$0 sm:$0xff]  ;;  %vm1038_vm13 = vcmask 1044484   ;;  %s1334_s15 = sshll.u32 %s1528_s28, 1  ;;  %vm1040_vm15 = vcmask 1045509  }
  0x11   : > { %1435 = vmatprep.subr.bf16.mxu1 %v1460_v3  ;;  %s1333_s14 = sshll.u32 %s2008_s9, 3  ;;  %v1597_v36 = vld [vmem:[%s1975_s2] ss:$0 sm:$0xff]  ;;  %p1785_p4 = scmp.lt.s32.totalorder %s1334_s15, 3  ;;  %vm1042_vm0 = vcmask 1046534  }
  0x12   : > { %s1548_s19 = scalar_lea.vmem %s1973_s0, %s1333_s14  ;;  %s1356_s14 = sshll.u32 %s1528_s28, 7 }
  0x13   : > { %v340_v5 = vld [vmem:[%s1548_s19] sm:$0xff]  ;;  %v341_v6 = vld [vmem:[%s1548_s19 + $0x8] sm:$0xff]  ;;  %v342_v7 = vld [vmem:[%s1548_s19 + $0x10] sm:$0xff]  ;;  %s2010_s15 = smov (!%p1785_p4, %s1334_s15), 3  ;;  %s1867_s24 = ssub.s32 192, %s1356_s14 }
  0x14   : > { %1443 = vmatpush3.bf16.msra.mxu1 %v1460_v3  ;;  %v356_v8 = vpack.c.bf16 %v341_v6, %v340_v5  ;;  %v343_v9 = vld [vmem:[%s1548_s19 + $0x18] sm:$0xff]  ;;  %v344_v10 = vld [vmem:[%s1548_s19 + $0x20] sm:$0xff]  ;;  %v345_v11 = vld [vmem:[%s1548_s19 + $0x28] sm:$0xff]  ;;  %s1335_s17 = sshll.u32 %s2010_s15, 3  ;;  %p822_p5 = scmp.lt.s32.totalorder %s1867_s24, 128 }
  0x15   : > { %1436 = vmatprep.subr.bf16.mxu1 %v1461_v4  ;;  %v357_v12 = vpack.c.bf16 %v343_v9, %v342_v7  ;;  %v358_v13 = vpack.c.bf16 %v345_v11, %v344_v10  ;;  %v346_v14 = vld [vmem:[%s1548_s19 + $0x30] sm:$0xff]  ;;  %v347_v16 = vld [vmem:[%s1548_s19 + $0x38] sm:$0xff]  ;;  %v348_v17 = vld [vmem:[%s1548_s19 + $0x40] sm:$0xff]  ;;  %s1828_s20 = scalar_lea.vmem %s1980_s7, %s1335_s17  ;;  %s1833_s23 = scalar_lea.vmem %s1981_s8, %s1335_s17 }
  0x16   : > { %1386 = vmatprep.mubr.msk.bf16.mxu0 %vm365_vm1, %v356_v8  ;;  %v349_v18 = vld [vmem:[%s1548_s19 + $0x48] sm:$0xff]  ;;  %v359_v20 = vpack.c.bf16 %v347_v16, %v346_v14  ;;  %v350_v22 = vld [vmem:[%s1548_s19 + $0x50] sm:$0xff]  ;;  %v351_v23 = vld [vmem:[%s1548_s19 + $0x58] sm:$0xff]  ;;  %s2012_s24 = smov (!%p822_p5, %s1867_s24), 128  ;;  %p321_p6 = scmp.lt.s32.totalorder %s1528_s28, 1 }
  0x17   : > { %1387 = vmatmul.mubr.msk.bf16.vlgmr.msra.gmra.mrb[0].mxu0 %vm365_vm1, %v357_v12  ;;  %v360_v21 = vpack.c.bf16 %v349_v18, %v348_v17  ;;  %v352_v24 = vld [vmem:[%s1548_s19 + $0x60] sm:$0xff]  ;;  %v353_v25 = vld [vmem:[%s1548_s19 + $0x68] sm:$0xff]  ;;  %v361_v26 = vpack.c.bf16 %v351_v23, %v350_v22  ;;  %v354_v28 = vld [vmem:[%s1548_s19 + $0x70] sm:$0xff]  ;;  %s824_s25 = scvt.s32.f32 %s2012_s24 }
  0x18   : > { %1444 = vmatpush3.bf16.msra.mxu1 %v1461_v4  ;;  %1390 = vmatprep.mubr.msk.bf16.mxu0 %vm365_vm1, %v358_v13  ;;  %v362_v27 = vpack.c.bf16 %v353_v25, %v352_v24  ;;  %v355_v29 = vld [vmem:[%s1548_s19 + $0x78] sm:$0xff]  ;;  %s2014_s28 = smov (!%p321_p6, %s1528_s28), 1 }
  0x19   : > { %1403 = vmatpush3.bf16.msra.mxu0 %v1459_v1  ;;  %1437 = vmatprep.subr.bf16.mxu1 %v1462_v15  ;;  %v363_v30 = vpack.c.bf16 %v355_v29, %v354_v28  ;;  %s323_s30 = scalar_lea.vmem %s1978_s5, %s2014_s28  ;;  %s326_s11 = scalar_lea.vmem %s1979_s6, %s2014_s28 }
  0x1a   : > { %1404 = vmatprep.subr.bf16.mxu0 %v1460_v3 }
  0x1c   : > { %1445 = vmatpush3.bf16.msra.mxu1 %v1462_v15 }
  0x1d   : > { %1405 = vmatpush3.bf16.msra.mxu0 %v1460_v3  ;;  %1438 = vmatprep.subr.bf16.mxu1 %v1463_v19 }
  0x1e   : > { %1406 = vmatprep.subr.bf16.mxu0 %v1461_v4 }
  0x1f   : > { %1391 = vmatmul.mubr.msk.bf16.gmra.mrb[4].mxu0 %vm365_vm1, %v359_v20 }
  0x20   : > { %1446 = vmatpush3.bf16.msra.mxu1 %v1463_v19  ;;  %1394 = vmatprep.mubr.msk.bf16.mxu0 %vm365_vm1, %v360_v21 }
  0x21   : > { %1407 = vmatpush3.bf16.msra.mxu0 %v1461_v4  ;;  %1439 = vmatprep.subr.bf16.mxu1 %v1464_v31 }
  0x22   : > { %1408 = vmatprep.subr.bf16.mxu0 %v1462_v15 }
  0x24   : > { %1447 = vmatpush3.bf16.msra.mxu1 %v1464_v31 }
  0x25   : > { %1409 = vmatpush3.bf16.msra.mxu0 %v1462_v15  ;;  %1440 = vmatprep.subr.bf16.mxu1 %v1465_v32 }
  0x26   : > { %1410 = vmatprep.subr.bf16.mxu0 %v1463_v19 }
  0x27   : > { %1395 = vmatmul.mubr.msk.bf16.gmra.mrb[8].mxu0 %vm365_vm1, %v361_v26 }
  0x28   : > { %1398 = vmatprep.mubr.msk.bf16.mxu0 %vm365_vm1, %v362_v27  ;;  %1448 = vmatpush3.bf16.msra.mxu1 %v1465_v32 }
  0x29   : > { %1411 = vmatpush3.bf16.msra.mxu0 %v1463_v19  ;;  %1441 = vmatprep.subr.bf16.mxu1 %v1466_v33 }
  0x2a   : > { %1412 = vmatprep.subr.bf16.mxu0 %v1464_v31 }
  0x2c   : > { %1449 = vmatpush3.bf16.msra.mxu1 %v1466_v33 }
  0x2d   : > { %1413 = vmatpush3.bf16.msra.mxu0 %v1464_v31 }
  0x2e   : > { %1414 = vmatprep.subr.bf16.mxu0 %v1465_v32 }
  0x2f   : > { %1399 = vmatmul.mubr.msk.bf16.gmra.mrb[12].mxu0 %vm365_vm1, %v363_v30  ;;  %vm1044_vm1 = vcmask 1047559  }
  0x31   : > { %1415 = vmatpush3.bf16.msra.mxu0 %v1465_v32 }
  0x32   : > { %1416 = vmatprep.subr.bf16.mxu0 %v1466_v33 }
  0x35   : > { %1417 = vmatpush3.bf16.msra.mxu0 %v1466_v33 }
  0xea   : > { %v1388_v35 = vpop.f32.mrb[0].mxu0 }
  0xeb   : > { %v500_v37 = vmul.f32 %v1388_v35, %v1592_v34  ;;  %v428_v38 = vpop.f32.mrb[1].mxu0 }
  0xec   : > { %v498_v39 = vmul.f32 %v1592_v34, %v428_v38  ;;  %v1389_v40 = vpop.f32.mrb[2].mxu0 }
  0xed   : > { %v523_v41 = vadd.f32 %v1597_v36, %v500_v37  ;;  %v501_v42 = vmul.f32 %v1389_v40, %v1592_v34  ;;  %v431_v43 = vpop.f32.mrb[3].mxu0 }
  0xee   : > { %v521_v44 = vadd.f32 %v1597_v36, %v498_v39  ;;  %v499_v45 = vmul.f32 %v1592_v34, %v431_v43 }
  0xef   : > { %v524_v46 = vadd.f32 %v1597_v36, %v501_v42  ;;  %v539_v48 = vmax.f32 %v523_v41, 0.0 }
  0xf0   : > { %v522_v47 = vadd.f32 %v1597_v36, %v499_v45  ;;  %v537_v50 = vmax.f32 %v521_v44, 0.0 }
  0xf1   : > { %v540_v49 = vmax.f32 %v524_v46, 0.0  ;;  %v723_v46 = vlaneseq }
  0xf2   : > { %v538_v51 = vmax.f32 %v522_v47, 0.0  ;;  %v1392_v52 = vpop.f32.mrb[4].mxu0 }
  0xf3   : > { %v554_v53 = vpack.c.bf16 %v540_v49, %v539_v48  ;;  %v504_v54 = vmul.f32 %v1392_v52, %v1592_v34  ;;  %v444_v55 = vpop.f32.mrb[5].mxu0  ;;  %v1631_v47 = vshrl.u32 %v723_v46, 7  ;;  %v1638_v49 = vstv %s1356_s14 }
  0xf4   : > { %v502_v56 = vmul.f32 %v1592_v34, %v444_v55  ;;  %v1393_v57 = vpop.f32.mrb[6].mxu0  ;;  %v553_v58 = vpack.c.bf16 %v538_v51, %v537_v50 }
  0xf5   : > { %v527_v59 = vadd.f32 %v1597_v36, %v504_v54  ;;  %v505_v60 = vmul.f32 %v1393_v57, %v1592_v34  ;;  %v447_v61 = vpop.f32.mrb[7].mxu0  ;;  %v727_v48 = vadd.s32 24, %v1631_v47  ;;  %v728_v50 = vadd.s32 32, %v1631_v47 }
  0xf6   : > { %v503_v62 = vmul.f32 %v1592_v34, %v447_v61  ;;  %1418 = vmatprep.mubr.bf16.mxu0 %v553_v58  ;;  %v525_v63 = vadd.f32 %v1597_v36, %v502_v56  ;;  %v730_v55 = vadd.s32 48, %v1631_v47  ;;  %v731_v56 = vadd.s32 56, %v1631_v47 }
  0xf7   : > { %v528_v0 = vadd.f32 %v1597_v36, %v505_v60  ;;  %1419 = vmatmul.mubr.bf16.vlgmr.msra.gmra.mrb[16].mxu0 %v554_v53  ;;  %v543_v2 = vmax.f32 %v527_v59, 0.0  ;;  %v1646_v52 = vadd.s32 %v1638_v49, %v727_v48  ;;  %v1650_v53 = vadd.s32 %v1638_v49, %v1631_v47 }
  0xf8   : > { %v526_v1 = vadd.f32 %v1597_v36, %v503_v62  ;;  %v541_v5 = vmax.f32 %v525_v63, 0.0  ;;  %v729_v57 = vadd.s32 40, %v1631_v47  ;;  %v734_v58 = vadd.s32 80, %v1631_v47 }
  0xf9   : > { %v544_v3 = vmax.f32 %v528_v0, 0.0  ;;  %v1660_v59 = vadd.s32 %v1638_v49, %v728_v50  ;;  %vm760_vm3 = vcmp.lt.s32.totalorder %v1646_v52, 192  ;;  %vm757_vm4 = vcmp.lt.s32.totalorder %v1650_v53, 192 }
  0xfa   : > { %v1396_v4 = vpop.f32.mrb[8].mxu0  ;;  %v542_v6 = vmax.f32 %v526_v1, 0.0  ;;  %v1672_v63 = vadd.s32 %v1638_v49, %v730_v55  ;;  %v1675_v0 = vadd.s32 %v1638_v49, %v731_v56  ;;  %v738_v56 = vadd.s32 112, %v1631_v47 }
  0xfb   : > { %v508_v7 = vmul.f32 %v1396_v4, %v1592_v34  ;;  %v460_v8 = vpop.f32.mrb[9].mxu0  ;;  %v556_v9 = vpack.c.bf16 %v544_v3, %v543_v2  ;;  %v1681_v3 = vadd.s32 %v1638_v49, %v729_v57  ;;  %v1684_v4 = vadd.s32 %v1638_v49, %v734_v58 }
  0xfc   : > { %v506_v10 = vmul.f32 %v1592_v34, %v460_v8  ;;  %v1397_v11 = vpop.f32.mrb[10].mxu0  ;;  %v555_v12 = vpack.c.bf16 %v542_v6, %v541_v5  ;;  %1992 = vst [vmem:[#allocation2_spill] sm:$0xff] %v1672_v63  ;;  %1993 = vst [vmem:[#allocation3_spill] sm:$0xff] %v1675_v0  ;;  %v732_v5 = vadd.s32 64, %v1631_v47  ;;  %vm761_vm6 = vcmp.lt.s32.totalorder %v1660_v59, 192 }
  0xfd   : > { %v531_v13 = vadd.f32 %v1597_v36, %v508_v7  ;;  %v509_v14 = vmul.f32 %v1397_v11, %v1592_v34  ;;  %v463_v15 = vpop.f32.mrb[11].mxu0  ;;  %1994 = vst [vmem:[#allocation4_spill] sm:$0xff] %v1681_v3  ;;  %vm1989_vm10 = vcmp.lt.s32.totalorder %v1681_v3, 192  ;;  %vm1983_vm11 = vcmp.lt.s32.totalorder %v1672_v63, 192 }
  0xfe   : > { %v529_v16 = vadd.f32 %v1597_v36, %v506_v10  ;;  %v507_v17 = vmul.f32 %v1592_v34, %v463_v15  ;;  %1422 = vmatprep.mubr.bf16.mxu1 %v555_v12  ;;  %vm1982_vm12 = vcmp.lt.s32.totalorder %v1675_v0, 192 }
  0xff   : > { %v532_v18 = vadd.f32 %v1597_v36, %v509_v14  ;;  %1423 = vmatmul.mubr.bf16.vlgmr.msra.gmra.mrb[0].mxu1 %v556_v9  ;;  %v547_v20 = vmax.f32 %v531_v13, 0.0 }
 0x100   : > { %v530_v19 = vadd.f32 %v1597_v36, %v507_v17  ;;  %v545_v22 = vmax.f32 %v529_v16, 0.0 }
 0x101   : > { %v548_v21 = vmax.f32 %v532_v18, 0.0 }
 0x102   : > { %v546_v23 = vmax.f32 %v530_v19, 0.0  ;;  %v1400_v24 = vpop.f32.mrb[12].mxu0 }
 0x103   : > { %v512_v25 = vmul.f32 %v1400_v24, %v1592_v34  ;;  %v476_v26 = vpop.f32.mrb[13].mxu0  ;;  %v558_v27 = vpack.c.bf16 %v548_v21, %v547_v20 }
 0x104   : > { %v510_v28 = vmul.f32 %v1592_v34, %v476_v26  ;;  %v1401_v29 = vpop.f32.mrb[14].mxu0  ;;  %v557_v30 = vpack.c.bf16 %v546_v23, %v545_v22  ;;  %v735_v22 = vadd.s32 88, %v1631_v47  ;;  %v1997_v53 = vld [vmem:[#allocation4_spill] sm:$0xff] }
 0x105   : > { %v535_v31 = vadd.f32 %v1597_v36, %v512_v25  ;;  %v513_v32 = vmul.f32 %v1401_v29, %v1592_v34  ;;  %v479_v33 = vpop.f32.mrb[15].mxu0 }
 0x106   : > { %v533_v35 = vadd.f32 %v1597_v36, %v510_v28  ;;  %v511_v37 = vmul.f32 %v1592_v34, %v479_v33  ;;  %1426 = vmatprep.mubr.bf16.mxu1 %v557_v30  ;;  %v726_v34 = vadd.s32 16, %v1631_v47  ;;  %v1726_v48 = vadd.s32 %v1638_v49, %v735_v22 }
 0x107   : > { %v536_v38 = vadd.f32 %v1597_v36, %v513_v32  ;;  %1427 = vmatmul.mubr.bf16.gmra.mrb[4].mxu1 %v558_v27  ;;  %v551_v40 = vmax.f32 %v535_v31, 0.0  ;;  %v733_v31 = vadd.s32 72, %v1631_v47 }
 0x108   : > { %v534_v39 = vadd.f32 %v1597_v36, %v511_v37  ;;  %v549_v42 = vmax.f32 %v533_v35, 0.0  ;;  %v725_v36 = vadd.s32 8, %v1631_v47  ;;  %v1643_v51 = vadd.s32 %v1638_v49, %v726_v34 }
 0x109   : > { %v552_v41 = vmax.f32 %v536_v38, 0.0  ;;  %v1731_v55 = vadd.s32 %v1638_v49, %v733_v31 }
 0x10a   : > { %v550_v43 = vmax.f32 %v534_v39, 0.0  ;;  %v1653_v54 = vadd.s32 %v1638_v49, %v725_v36  ;;  %vm759_vm2 = vcmp.lt.s32.totalorder %v1643_v51, 192 }
 0x10b   : > { %v560_v44 = vpack.c.bf16 %v552_v41, %v551_v40 }
 0x10c   : > { %v559_v45 = vpack.c.bf16 %v550_v43, %v549_v42  ;;  %vm758_vm5 = vcmp.lt.s32.totalorder %v1653_v54, 192  ;;  %v1721_v43 = vadd.s32 %v1638_v49, %v732_v5 }
 0x10e   : > { %1430 = vmatprep.mubr.bf16.mxu1 %v559_v45  ;;  %1995 = vst [vmem:[#allocation5_spill] sm:$0xff] %v1721_v43  ;;  %vm1984_vm14 = vcmp.lt.s32.totalorder %v1721_v43, 192 }
 0x10f   : > { %1431 = vmatmul.mubr.bf16.gmra.mrb[8].mxu1 %v560_v44 }
 0x1ca   : > { %v1662_v60 = vpop.f32.mrb[16].mxu0 }
 0x1cb   : > { %v932_v61 = vrot.slane %v1662_v60, 4  ;;  %v1668_v62 = vpop.f32.mrb[17].mxu0  ;;  %v807_v23 = vsel %vm759_vm2, %v1662_v60, 0.0 }
 0x1cc   : > { %v920_v1 = vrot.slane %v1668_v62, 4  ;;  %v1678_v2 = vpop.f32.mrb[18].mxu0  ;;  %v805_v10 = vsel %vm757_vm4, %v1668_v62, 0.0 }
 0x1cd   : > { %v933_v6 = vmax.f32 %v1662_v60, %v932_v61  ;;  %v1070_v7 = vmin.f32 %v1662_v60, %v932_v61  ;;  %v938_v8 = vrot.slane %v1678_v2, 4  ;;  %v1690_v9 = vpop.f32.mrb[19].mxu0  ;;  %v808_v33 = vsel %vm760_vm3, %v1678_v2, 0.0 }
 0x1ce   : > { %v921_v11 = vmax.f32 %v1668_v62, %v920_v1  ;;  %v1058_v12 = vmin.f32 %v1668_v62, %v920_v1  ;;  %v806_v13 = vsel %vm758_vm5, %v1690_v9, 0.0  ;;  %v926_v14 = vrot.slane %v1690_v9, 4 }
 0x1cf   : > { %v934_v15 = vrot.slane %v933_v6, 2  ;;  %v1071_v16 = vrot.slane %v1070_v7, 2  ;;  %v939_v17 = vmax.f32 %v1678_v2, %v938_v8  ;;  %v1076_v18 = vmin.f32 %v1678_v2, %v938_v8 }
 0x1d0   : > { %v922_v19 = vrot.slane %v921_v11, 2  ;;  %v825_v20 = vadd.f32 %v806_v13, %v805_v10  ;;  %v927_v21 = vmax.f32 %v1690_v9, %v926_v14  ;;  %v1059_v25 = vrot.slane %v1058_v12, 2 }
 0x1d1   : > { %v935_v24 = vmax.f32 %v933_v6, %v934_v15  ;;  %v940_v26 = vrot.slane %v939_v17, 2  ;;  %v1072_v32 = vmin.f32 %v1070_v7, %v1071_v16  ;;  %v1077_v37 = vrot.slane %v1076_v18, 2 }
 0x1d2   : > { %v923_v27 = vmax.f32 %v921_v11, %v922_v19  ;;  %v826_v28 = vadd.f32 %v825_v20, %v807_v23  ;;  %v928_v29 = vrot.slane %v927_v21, 2  ;;  %v1709_v30 = vpop.f32.mrb[0].mxu1  ;;  %v1060_v45 = vmin.f32 %v1058_v12, %v1059_v25 }
 0x1d3   : > { %v941_v35 = vmax.f32 %v939_v17, %v940_v26  ;;  %v1715_v38 = vpop.f32.mrb[1].mxu1  ;;  %v936_v44 = vrot.slane %v935_v24, 1  ;;  %v1064_v50 = vmin.f32 %v1690_v9, %v926_v14  ;;  %v1073_v57 = vrot.slane %v1072_v32, 1 }
 0x1d4   : > { %v924_v39 = vrot.slane %v923_v27, 1  ;;  %v827_v40 = vadd.f32 %v826_v28, %v808_v33  ;;  %v929_v41 = vmax.f32 %v927_v21, %v928_v29  ;;  %v1718_v42 = vpop.f32.mrb[2].mxu1  ;;  %v1078_v61 = vmin.f32 %v1076_v18, %v1077_v37 }
 0x1d5   : > { %v942_v46 = vrot.slane %v941_v35, 1  ;;  %v1723_v34 = vpop.f32.mrb[3].mxu1  ;;  %v956_v1 = vrot.slane %v1709_v30, 4  ;;  %v1065_v6 = vrot.slane %v1064_v50, 2  ;;  %v809_v7 = vsel %vm761_vm6, %v1715_v38, 0.0 }
 0x1d6   : > { %v930_v36 = vrot.slane %v929_v41, 1  ;;  %v925_v58 = vmax.f32 %v923_v27, %v924_v39  ;;  %v944_v8 = vrot.slane %v1715_v38, 4  ;;  %v937_v10 = vmax.f32 %v935_v24, %v936_v44 }
 0x1d7   : > { %v1061_v11 = vrot.slane %v1060_v45, 1  ;;  %v943_v12 = vmax.f32 %v941_v35, %v942_v46  ;;  %v828_v13 = vadd.f32 %v827_v40, %v809_v7  ;;  %v1066_v15 = vmin.f32 %v1064_v50, %v1065_v6 }
 0x1d8   : > { %v931_v5 = vmax.f32 %v929_v41, %v930_v36  ;;  %v945_v16 = vmax.f32 %v1715_v38, %v944_v8  ;;  %v1082_v17 = vmin.f32 %v1715_v38, %v944_v8  ;;  %v1079_v19 = vrot.slane %v1078_v61, 1 }
 0x1d9   : > { %v957_v21 = vmax.f32 %v1709_v30, %v956_v1  ;;  %v962_v22 = vrot.slane %v1718_v42, 4  ;;  %v1067_v25 = vrot.slane %v1066_v15, 1  ;;  %v1062_v29 = vmin.f32 %v1060_v45, %v1061_v11 }
 0x1da   : > { %v1033_v14 = vsel %vm1032_vm7, %v931_v5, %v925_v58  ;;  %v1743_v18 = vpop.f32.mrb[4].mxu1  ;;  %v946_v26 = vrot.slane %v945_v16, 2  ;;  %v1083_v27 = vrot.slane %v1082_v17, 2  ;;  %v1094_v31 = vmin.f32 %v1709_v30, %v956_v1 }
 0x1db   : > { %v1035_v20 = vsel %vm1034_vm8, %v937_v10, %v1033_v14  ;;  %v1749_v23 = vpop.f32.mrb[5].mxu1  ;;  %v963_v33 = vmax.f32 %v1718_v42, %v962_v22  ;;  %v1100_v35 = vmin.f32 %v1718_v42, %v962_v22  ;;  %v1068_v39 = vmin.f32 %v1066_v15, %v1067_v25 }
 0x1dc   : > { %v1037_v24 = vsel %vm1036_vm9, %v943_v12, %v1035_v20  ;;  %v1752_v28 = vpop.f32.mrb[6].mxu1  ;;  %v947_v40 = vmax.f32 %v945_v16, %v946_v26  ;;  %v1084_v41 = vmin.f32 %v1082_v17, %v1083_v27  ;;  %v810_v44 = vsel %vm1989_vm10, %v1723_v34, 0.0 }
 0x1dd   : > { %v1757_v37 = vpop.f32.mrb[7].mxu1  ;;  %v1074_v46 = vmin.f32 %v1072_v32, %v1073_v57  ;;  %v1080_v36 = vmin.f32 %v1078_v61, %v1079_v19  ;;  %v958_v50 = vrot.slane %v957_v21, 2  ;;  %v736_v45 = vadd.s32 96, %v1631_v47 }
 0x1de   : > { %v1169_v58 = vsel %vm1032_vm7, %v1068_v39, %v1062_v29  ;;  %v948_v1 = vrot.slane %v947_v40, 1  ;;  %v1085_v5 = vrot.slane %v1084_v41, 1  ;;  %v829_v6 = vadd.f32 %v828_v13, %v810_v44 }
 0x1df   : > { %v1170_v7 = vsel %vm1034_vm8, %v1074_v46, %v1169_v58  ;;  %v811_v8 = vsel %vm1983_vm11, %v1709_v30, 0.0  ;;  %v1095_v10 = vrot.slane %v1094_v31, 2  ;;  %v964_v11 = vrot.slane %v963_v33, 2 }
 0x1e0   : > { %v1171_v32 = vsel %vm1036_vm9, %v1080_v36, %v1170_v7  ;;  %v949_v57 = vmax.f32 %v947_v40, %v948_v1  ;;  %v1086_v61 = vmin.f32 %v1084_v41, %v1085_v5  ;;  %v1101_v12 = vrot.slane %v1100_v35, 2 }
 0x1e1   : > { %v812_v13 = vsel %vm1982_vm12, %v1718_v42, 0.0  ;;  %v830_v15 = vadd.f32 %v829_v6, %v811_v8  ;;  %v950_v16 = vrot.slane %v1723_v34, 4  ;;  %v1777_v17 = vadd.s32 %v1638_v49, %v738_v56 }
 0x1e2   : > { %v1770_v14 = vpop.f32.mrb[8].mxu1  ;;  %v959_v20 = vmax.f32 %v957_v21, %v958_v50  ;;  %v1039_v22 = vsel %vm1038_vm13, %v949_v57, %v1037_v24  ;;  %v1172_v25 = vsel %vm1038_vm13, %v1086_v61, %v1171_v32  ;;  %v980_v26 = vrot.slane %v1743_v18, 4 }
 0x1e3   : > { %v1779_v19 = vpop.f32.mrb[9].mxu1  ;;  %v1096_v29 = vmin.f32 %v1094_v31, %v1095_v10  ;;  %v951_v56 = vmax.f32 %v1723_v34, %v950_v16  ;;  %v1088_v21 = vmin.f32 %v1723_v34, %v950_v16  ;;  %v813_v24 = vsel %vm1984_vm14, %v1749_v23, 0.0 }
 0x1e4   : > { %v1790_v27 = vpop.f32.mrb[10].mxu1  ;;  %v965_v40 = vmax.f32 %v963_v33, %v964_v11  ;;  %v1102_v41 = vmin.f32 %v1100_v35, %v1101_v12  ;;  %v981_v44 = vmax.f32 %v1743_v18, %v980_v26  ;;  %v831_v46 = vadd.f32 %v830_v15, %v812_v13 }
 0x1e5   : > { %v1797_v39 = vpop.f32.mrb[11].mxu1  ;;  %v952_v31 = vrot.slane %v951_v56, 2  ;;  %v1089_v36 = vrot.slane %v1088_v21, 2  ;;  %vm767_vm12 = vcmp.lt.s32.totalorder %v1684_v4, 192  ;;  %v1118_v50 = vmin.f32 %v1743_v18, %v980_v26 }
 0x1e6   : > { %v968_v58 = vrot.slane %v1749_v23, 4  ;;  %vm1990_vm11 = vcmp.lt.s32.totalorder %v1726_v48, 192  ;;  %vm766_vm14 = vcmp.lt.s32.totalorder %v1731_v55, 192  ;;  %v960_v1 = vrot.slane %v959_v20, 1 }
 0x1e7   : > { %v832_v33 = vadd.f32 %v831_v46, %v813_v24  ;;  %v986_v35 = vrot.slane %v1752_v28, 4  ;;  %v739_v5 = vadd.s32 120, %v1631_v47  ;;  %v953_v6 = vmax.f32 %v951_v56, %v952_v31 }
 0x1e8   : > { %v1090_v7 = vmin.f32 %v1088_v21, %v1089_v36  ;;  %v969_v8 = vmax.f32 %v1749_v23, %v968_v58  ;;  %v1815_v10 = vadd.s32 %v1638_v49, %v736_v45  ;;  %v1097_v11 = vrot.slane %v1096_v29, 1 }
 0x1e9   : > { %v966_v32 = vrot.slane %v965_v40, 1  ;;  %v1103_v57 = vrot.slane %v1102_v41, 1  ;;  %v982_v61 = vrot.slane %v981_v44, 2  ;;  %v954_v12 = vrot.slane %v953_v6, 1 }
 0x1ea   : > { %v1091_v13 = vrot.slane %v1090_v7, 1  ;;  %v1119_v15 = vrot.slane %v1118_v50, 2  ;;  %v1106_v16 = vmin.f32 %v1749_v23, %v968_v58  ;;  %v961_v26 = vmax.f32 %v959_v20, %v960_v1 }
 0x1eb   : > { %v987_v24 = vmax.f32 %v1752_v28, %v986_v35  ;;  %v1821_v56 = vadd.s32 %v1638_v49, %v739_v5  ;;  %v737_v21 = vadd.s32 104, %v1631_v47  ;;  %v955_v45 = vmax.f32 %v953_v6, %v954_v12 }
 0x1ec   : > { %v1092_v46 = vmin.f32 %v1090_v7, %v1091_v13  ;;  %v970_v31 = vrot.slane %v969_v8, 2  ;;  %v1124_v36 = vmin.f32 %v1752_v28, %v986_v35  ;;  %v1098_v43 = vmin.f32 %v1096_v29, %v1097_v11 }
 0x1ed   : > { %v967_v0 = vmax.f32 %v965_v40, %v966_v32  ;;  %v1104_v63 = vmin.f32 %v1102_v41, %v1103_v57  ;;  %v983_v3 = vmax.f32 %v981_v44, %v982_v61  ;;  %v1041_v47 = vsel %vm1040_vm15, %v955_v45, %v1039_v22 }
 0x1ee   : > { %v1173_v20 = vsel %vm1040_vm15, %v1092_v46, %v1172_v25  ;;  %v1120_v29 = vmin.f32 %v1118_v50, %v1119_v15  ;;  %v1107_v40 = vrot.slane %v1106_v16, 2  ;;  %v1043_v41 = vsel %vm1042_vm0, %v961_v26, %v1041_v47 }
 0x1ef   : > { %v1174_v44 = vsel %vm1042_vm0, %v1098_v43, %v1173_v20  ;;  %v988_v58 = vrot.slane %v987_v24, 2  ;;  %v1840_v1 = vadd.s32 %v1638_v49, %v737_v21  ;;  %v1045_v35 = vsel %vm1044_vm1, %v967_v0, %v1043_v41 }
 0x1f0   : > { %v1175_v5 = vsel %vm1044_vm1, %v1104_v63, %v1174_v44  ;;  %v971_v6 = vmax.f32 %v969_v8, %v970_v31  ;;  %v1125_v7 = vrot.slane %v1124_v36, 2  ;;  %1055 = vst [vmem:[%s1828_s20] sm:$0xff] %v1045_v35  ;;  %v815_v22 = vsel %vm767_vm12, %v1743_v18, 0.0 }
 0x1f1   : > { %1185 = vst [vmem:[%s1833_s23] sm:$0xff] %v1175_v5  ;;  %v816_v43 = vsel %vm1990_vm11, %v1752_v28, 0.0  ;;  %v814_v49 = vsel %vm766_vm14, %v1757_v37, 0.0  ;;  %v974_v0 = vrot.slane %v1757_v37, 4  ;;  %vm1991_vm10 = vcmp.lt.s32.totalorder %v1815_v10, 192 }
 0x1f2   : > { %v984_v63 = vrot.slane %v983_v3, 1  ;;  %v1121_v25 = vrot.slane %v1120_v29, 1  ;;  %v1108_v50 = vmin.f32 %v1106_v16, %v1107_v40  ;;  %v833_v8 = vadd.f32 %v832_v33, %v814_v49 }
 0x1f3   : > { %v989_v11 = vmax.f32 %v987_v24, %v988_v58  ;;  %v975_v32 = vmax.f32 %v1757_v37, %v974_v0  ;;  %v1112_v57 = vmin.f32 %v1757_v37, %v974_v0  ;;  %v992_v61 = vrot.slane %v1779_v19, 4 }
 0x1f4   : > { %v972_v12 = vrot.slane %v971_v6, 1  ;;  %v1126_v13 = vmin.f32 %v1124_v36, %v1125_v7  ;;  %v834_v15 = vadd.f32 %v833_v8, %v815_v22  ;;  %v1004_v26 = vrot.slane %v1770_v14, 4 }
 0x1f5   : > { %v976_v21 = vrot.slane %v975_v32, 2  ;;  %v1113_v45 = vrot.slane %v1112_v57, 2  ;;  %v993_v46 = vmax.f32 %v1779_v19, %v992_v61  ;;  %v1130_v16 = vmin.f32 %v1779_v19, %v992_v61 }
 0x1f6   : > { %vm770_vm11 = vcmp.lt.s32.totalorder %v1840_v1, 192  ;;  %v985_v33 = vmax.f32 %v983_v3, %v984_v63  ;;  %v1122_v24 = vmin.f32 %v1120_v29, %v1121_v25  ;;  %v1109_v31 = vrot.slane %v1108_v50, 1 }
 0x1f7   : > { %v1010_v47 = vrot.slane %v1790_v27, 4  ;;  %v977_v36 = vmax.f32 %v975_v32, %v976_v21  ;;  %v1114_v20 = vmin.f32 %v1112_v57, %v1113_v45  ;;  %v994_v40 = vrot.slane %v993_v46, 2 }
 0x1f8   : > { %v1131_v41 = vrot.slane %v1130_v16, 2  ;;  %v973_v44 = vmax.f32 %v971_v6, %v972_v12  ;;  %v990_v58 = vrot.slane %v989_v11, 1  ;;  %v1127_v35 = vrot.slane %v1126_v13, 1 }
 0x1f9   : > { %v1005_v5 = vmax.f32 %v1770_v14, %v1004_v26  ;;  %v978_v7 = vrot.slane %v977_v36, 1  ;;  %v1115_v22 = vrot.slane %v1114_v20, 1  ;;  %v995_v3 = vmax.f32 %v993_v46, %v994_v40 }
 0x1fa   : > { %v1132_v29 = vmin.f32 %v1130_v16, %v1131_v41  ;;  %v1110_v49 = vmin.f32 %v1108_v50, %v1109_v31  ;;  %v1142_v0 = vmin.f32 %v1770_v14, %v1004_v26  ;;  %v1011_v63 = vmax.f32 %v1790_v27, %v1010_v47 }
 0x1fb   : > { %v1148_v25 = vmin.f32 %v1790_v27, %v1010_v47  ;;  %v979_v8 = vmax.f32 %v977_v36, %v978_v7  ;;  %v1116_v6 = vmin.f32 %v1114_v20, %v1115_v22  ;;  %v996_v32 = vrot.slane %v995_v3, 1 }
 0x1fc   : > { %v1133_v57 = vrot.slane %v1132_v29, 1  ;;  %v991_v61 = vmax.f32 %v989_v11, %v990_v58  ;;  %v1128_v12 = vmin.f32 %v1126_v13, %v1127_v35  ;;  %v1006_v21 = vrot.slane %v1005_v5, 2 }
 0x1fd   : > { %v817_v45 = vsel %vm1991_vm10, %v1779_v19, 0.0  ;;  %v1046_v50 = vsel %vm1032_vm7, %v979_v8, %v973_v44  ;;  %v1176_v46 = vsel %vm1032_vm7, %v1116_v6, %v1110_v49  ;;  %v997_v26 = vmax.f32 %v995_v3, %v996_v32 }
 0x1fe   : > { %v1134_v16 = vmin.f32 %v1132_v29, %v1133_v57  ;;  %v1047_v31 = vsel %vm1034_vm8, %v985_v33, %v1046_v50  ;;  %v1177_v47 = vsel %vm1034_vm8, %v1122_v24, %v1176_v46  ;;  %v1143_v36 = vrot.slane %v1142_v0, 2 }
 0x1ff   : > { %v1012_v11 = vrot.slane %v1011_v63, 2  ;;  %v1149_v13 = vrot.slane %v1148_v25, 2  ;;  %v835_v20 = vadd.f32 %v834_v15, %v816_v43  ;;  %v998_v40 = vrot.slane %v1797_v39, 4 }
 0x200   : > { %v1048_v41 = vsel %vm1036_vm9, %v991_v61, %v1047_v31  ;;  %vm771_vm10 = vcmp.lt.s32.totalorder %v1777_v17, 192  ;;  %v818_v44 = vsel %vm770_vm11, %v1797_v39, 0.0  ;;  %v1178_v33 = vsel %vm1036_vm9, %v1128_v12, %v1177_v47 }
 0x201   : > { %v1049_v58 = vsel %vm1038_vm13, %v997_v26, %v1048_v41  ;;  %v836_v24 = vadd.f32 %v835_v20, %v817_v45  ;;  %v999_v35 = vmax.f32 %v1797_v39, %v998_v40  ;;  %v1136_v43 = vmin.f32 %v1797_v39, %v998_v40 }
 0x202   : > { %v1179_v15 = vsel %vm1038_vm13, %v1134_v16, %v1178_v33  ;;  %v1007_v7 = vmax.f32 %v1005_v5, %v1006_v21  ;;  %v1144_v22 = vmin.f32 %v1142_v0, %v1143_v36  ;;  %vm772_vm7 = vcmp.lt.s32.totalorder %v1821_v56, 192 }
 0x203   : > { %v1013_v3 = vmax.f32 %v1011_v63, %v1012_v11  ;;  %v1150_v29 = vmin.f32 %v1148_v25, %v1149_v13  ;;  %v837_v49 = vadd.f32 %v836_v24, %v818_v44  ;;  %v1000_v8 = vrot.slane %v999_v35, 2 }
 0x204   : > { %v1137_v6 = vrot.slane %v1136_v43, 2  ;;  %v819_v32 = vsel %vm771_vm10, %v1770_v14, 0.0  ;;  %v846_v61 = vstv %s824_s25  ;;  %v1008_v50 = vrot.slane %v1007_v7, 1 }
 0x205   : > { %v838_v57 = vadd.f32 %v837_v49, %v819_v32  ;;  %v1001_v12 = vmax.f32 %v999_v35, %v1000_v8  ;;  %v1145_v46 = vrot.slane %v1144_v22, 1  ;;  %v820_v5 = vsel %vm772_vm7, %v1790_v27, 0.0 }
 0x206   : > { %v1138_v45 = vmin.f32 %v1136_v43, %v1137_v6  ;;  %v1014_v0 = vrot.slane %v1013_v3, 1  ;;  %v1151_v63 = vrot.slane %v1150_v29, 1  ;;  %1467 = vrcp.f32 %v846_v61 }
 0x207   : > { %v839_v25 = vadd.f32 %v838_v57, %v820_v5  ;;  %v1002_v21 = vrot.slane %v1001_v12, 1  ;;  %v1009_v36 = vmax.f32 %v1007_v7, %v1008_v50  ;;  %v1146_v11 = vmin.f32 %v1144_v22, %v1145_v46 }
 0x208   : > { %v1139_v26 = vrot.slane %v1138_v45, 1  ;;  %v1015_v13 = vmax.f32 %v1013_v3, %v1014_v0  ;;  %v1152_v20 = vmin.f32 %v1150_v29, %v1151_v63  ;;  %vm2006_vm8 = vcmp.lt.s32.totalorder %v1815_v10, 192 }
 0x209   : > { %v840_v16 = vrot.slane %v839_v25, 4  ;;  %v1003_v31 = vmax.f32 %v1001_v12, %v1002_v21 }
 0x20a   : > { %v1140_v47 = vmin.f32 %v1138_v45, %v1139_v26 }
 0x20b   : > { %v841_v40 = vadd.f32 %v840_v16, %v839_v25  ;;  %v1050_v41 = vsel %vm1040_vm15, %v1003_v31, %v1049_v58  ;;  %v1999_v25 = vld [vmem:[#allocation2_spill] sm:$0xff]  ;;  %v2001_v16 = vld [vmem:[#allocation3_spill] sm:$0xff] }
 0x20c   : > { %v1180_v44 = vsel %vm1040_vm15, %v1140_v47, %v1179_v15  ;;  %v1051_v33 = vsel %vm1042_vm0, %v1009_v36, %v1050_v41  ;;  %v2003_v36 = vld [vmem:[#allocation5_spill] sm:$0xff] }
 0x20d   : > { %v1181_v24 = vsel %vm1042_vm0, %v1146_v11, %v1180_v44  ;;  %v842_v35 = vrot.slane %v841_v40, 2  ;;  %v1052_v43 = vsel %vm1044_vm1, %v1015_v13, %v1051_v33 }
 0x20e   : > { %v1182_v49 = vsel %vm1044_vm1, %v1152_v20, %v1181_v24  ;;  %1056 = vst [vmem:[%s1828_s20 + $0x8] sm:$0xff] %v1052_v43 }
 0x20f   : > { %1186 = vst [vmem:[%s1833_s23 + $0x8] sm:$0xff] %v1182_v49  ;;  %v843_v7 = vadd.f32 %v842_v35, %v841_v40 }
 0x210   : > { %v1468_v3 = vpop.eup %1467 }
 0x211   : > { %v844_v22 = vrot.slane %v843_v7, 1 }
 0x213   : > { %v845_v58 = vadd.f32 %v844_v22, %v843_v7 }
 0x215   : > { %v848_v15 = vmul.f32 %v1468_v3, %v845_v58  ;;  %918 = vst [vmem:[%s323_s30] sm:$0x1] %v845_v58 }
 0x217   : > { %v849_v29 = vsub.f32 %v1668_v62, %v848_v15  ;;  %v850_v8 = vsub.f32 %v1690_v9, %v848_v15  ;;  %v851_v6 = vsub.f32 %v1662_v60, %v848_v15  ;;  %v852_v32 = vsub.f32 %v1678_v2, %v848_v15 }
 0x218   : > { %v853_v57 = vsub.f32 %v1715_v38, %v848_v15  ;;  %v854_v61 = vsub.f32 %v1723_v34, %v848_v15  ;;  %v855_v12 = vsub.f32 %v1709_v30, %v848_v15  ;;  %v856_v45 = vsub.f32 %v1718_v42, %v848_v15 }
 0x219   : > { %v857_v50 = vsub.f32 %v1749_v23, %v848_v15  ;;  %v858_v46 = vsub.f32 %v1757_v37, %v848_v15  ;;  %v859_v62 = vsub.f32 %v1743_v18, %v848_v15  ;;  %v860_v9 = vsub.f32 %v1752_v28, %v848_v15 }
 0x21a   : > { %v861_v60 = vsub.f32 %v1779_v19, %v848_v15  ;;  %v862_v2 = vsub.f32 %v1797_v39, %v848_v15  ;;  %v863_v38 = vsub.f32 %v1770_v14, %v848_v15  ;;  %v864_v34 = vsub.f32 %v1790_v27, %v848_v15 }
 0x21b   : > { %v865_v30 = vsel %vm757_vm4, %v849_v29, 0.0  ;;  %v866_v42 = vsel %vm758_vm5, %v850_v8, 0.0  ;;  %v867_v18 = vsel %vm759_vm2, %v851_v6, 0.0  ;;  %v868_v28 = vsel %vm760_vm3, %v852_v32, 0.0 }
 0x21c   : > { %v881_v23 = vmul.f32 %v865_v30, %v865_v30  ;;  %v882_v37 = vmul.f32 %v866_v42, %v866_v42  ;;  %v883_v19 = vmul.f32 %v867_v18, %v867_v18  ;;  %v869_v14 = vsel %vm761_vm6, %v853_v57, 0.0 }
 0x21d   : > { %v884_v27 = vmul.f32 %v868_v28, %v868_v28  ;;  %vm1998_vm4 = vcmp.lt.s32.totalorder %v1997_v53, 192  ;;  %v885_v54 = vmul.f32 %v869_v14, %v869_v14  ;;  %vm2000_vm5 = vcmp.lt.s32.totalorder %v1999_v25, 192 }
 0x21e   : > { %v897_v39 = vadd.f32 %v882_v37, %v881_v23  ;;  %v870_v0 = vsel %vm1998_vm4, %v854_v61, 0.0  ;;  %v871_v21 = vsel %vm2000_vm5, %v855_v12, 0.0  ;;  %vm2002_vm2 = vcmp.lt.s32.totalorder %v2001_v16, 192 }
 0x21f   : > { %v886_v51 = vmul.f32 %v870_v0, %v870_v0  ;;  %v872_v52 = vsel %vm2002_vm2, %v856_v45, 0.0  ;;  %v887_v31 = vmul.f32 %v871_v21, %v871_v21  ;;  %vm2004_vm3 = vcmp.lt.s32.totalorder %v2003_v36, 192 }
 0x220   : > { %v898_v5 = vadd.f32 %v897_v39, %v883_v19  ;;  %v873_v59 = vsel %vm2004_vm3, %v857_v50, 0.0  ;;  %v888_v11 = vmul.f32 %v872_v52, %v872_v52  ;;  %v874_v20 = vsel %vm766_vm14, %v858_v46, 0.0 }
 0x221   : > { %v889_v40 = vmul.f32 %v873_v59, %v873_v59  ;;  %v875_v44 = vsel %vm767_vm12, %v859_v62, 0.0  ;;  %v890_v33 = vmul.f32 %v874_v20, %v874_v20  ;;  %vm2005_vm6 = vcmp.lt.s32.totalorder %v1726_v48, 192 }
 0x222   : > { %v899_v63 = vadd.f32 %v898_v5, %v884_v27  ;;  %v876_v35 = vsel %vm2005_vm6, %v860_v9, 0.0  ;;  %v891_v43 = vmul.f32 %v875_v44, %v875_v44  ;;  %v877_v7 = vsel %vm2006_vm8, %v861_v60, 0.0 }
 0x223   : > { %v892_v22 = vmul.f32 %v876_v35, %v876_v35  ;;  %v878_v55 = vsel %vm770_vm11, %v862_v2, 0.0  ;;  %v893_v58 = vmul.f32 %v877_v7, %v877_v7  ;;  %v879_v4 = vsel %vm771_vm10, %v863_v38, 0.0 }
 0x224   : > { %v900_v26 = vadd.f32 %v899_v63, %v885_v54  ;;  %v894_v29 = vmul.f32 %v878_v55, %v878_v55  ;;  %v880_v48 = vsel %vm772_vm7, %v864_v34, 0.0  ;;  %v895_v6 = vmul.f32 %v879_v4, %v879_v4 }
 0x225   : > { %v896_v10 = vmul.f32 %v880_v48, %v880_v48 }
 0x226   : > { %v901_v47 = vadd.f32 %v900_v26, %v886_v51 }
 0x228   : > { %v902_v13 = vadd.f32 %v901_v47, %v887_v31 }
 0x22a   : > { %v903_v41 = vadd.f32 %v902_v13, %v888_v11 }
 0x22c   : > { %v904_v24 = vadd.f32 %v903_v41, %v889_v40 }
 0x22e   : > { %v905_v49 = vadd.f32 %v904_v24, %v890_v33 }
 0x230   : > { %v906_v3 = vadd.f32 %v905_v49, %v891_v43 }
 0x232   : > { %v907_v15 = vadd.f32 %v906_v3, %v892_v22 }
 0x234   : > { %v908_v8 = vadd.f32 %v907_v15, %v893_v58 }
 0x236   : > { %v909_v32 = vadd.f32 %v908_v8, %v894_v29 }
 0x238   : > { %v910_v57 = vadd.f32 %v909_v32, %v895_v6 }
 0x23a   : > { %v911_v61 = vadd.f32 %v910_v57, %v896_v10 }
 0x23c   : > { %v912_v12 = vrot.slane %v911_v61, 4 }
 0x23e   : > { %v913_v45 = vadd.f32 %v912_v12, %v911_v61 }
 0x240   : > { %v914_v1 = vrot.slane %v913_v45, 2 }
 0x242   : > { %v915_v50 = vadd.f32 %v914_v1, %v913_v45 }
 0x244   : > { %v916_v46 = vrot.slane %v915_v50, 1 }
 0x246   : > { %v917_v17 = vadd.f32 %v916_v46, %v915_v50 }
 0x248   : > { %919 = vst [vmem:[%s326_s11] sm:$0x1] %v917_v17 }
 0x249 PF: > { %s19_s27 = sadd.s32 1, %s1475_s27  }
 0x24a   : > { %p16_p7 = scmp.ge.s32.totalorder %s19_s27, 4  }
 0x24c   :  { %18 = sbr.rel (!%p16_p7) target bundleno = 1 (0x1), region = 106 }

</bundles_post_ra>
